<compile_context>
chip_gen: v7x
topology: tpu7x:2x2x1
jax: 0.10.0
libtpu: 0.0.40
codegen_flags: <defaults>
</compile_context>

<pallas_src>
import functools

import jax
import jax.numpy as jnp
from jax.experimental import pallas as pl
from jax.experimental.pallas import tpu as pltpu


# -----------------------------------------------------------------------------
# Fused matmul (+bias, +optional residual, +optional ReLU) Pallas kernels
# -----------------------------------------------------------------------------
def _mm_bias_act_kernel(x_ref, w_ref, b_ref, o_ref, acc_ref, *, relu):
    k = pl.program_id(0)

    @pl.when(k == 0)
    def _():
        acc_ref[...] = jnp.zeros_like(acc_ref)

    acc_ref[...] += jnp.dot(x_ref[...], w_ref[...],
                            preferred_element_type=jnp.float32)

    @pl.when(k == pl.num_programs(0) - 1)
    def _():
        y = acc_ref[...] + b_ref[...]
        if relu:
            y = jnp.maximum(y, 0.0)
        o_ref[...] = y.astype(o_ref.dtype)


def _mm_bias_res_relu_kernel(x_ref, w_ref, b_ref, r_ref, o_ref, acc_ref):
    k = pl.program_id(0)

    @pl.when(k == 0)
    def _():
        acc_ref[...] = jnp.zeros_like(acc_ref)

    acc_ref[...] += jnp.dot(x_ref[...], w_ref[...],
                            preferred_element_type=jnp.float32)

    @pl.when(k == pl.num_programs(0) - 1)
    def _():
        o_ref[...] = jnp.maximum(
            acc_ref[...] + b_ref[...] + r_ref[...], 0.0
        ).astype(o_ref.dtype)


def _round_up(x, m):
    return ((x + m - 1) // m) * m


_TK_CAP = 4608                       # max K chunk per grid step
_W_TILE_BUDGET = 6 * 1024 * 1024     # double-buffered bf16 weight tile budget


def _choose_k_tiling(k, cout):
    """Pick (padded K, K tile, #steps) so the dbl-buffered bf16 weight tile is small."""
    kp = _round_up(k, 128)
    tk = min(kp, _TK_CAP)
    while tk > 128 and 2 * tk * cout * 2 > _W_TILE_BUDGET:
        tk -= 128
    kp = _round_up(kp, tk)
    return kp, tk, kp // tk


def conv_bn_act(x, conv_w, bn, *, stride=1, padding=0, relu=True,
                residual=None, eps=1e-5):
    """Conv2d(bias=False) + folded eval-mode BN + optional residual add + ReLU.

    x: (N, H, W, Cin) NHWC f32; conv_w: (Cout, Cin, kh, kw) PyTorch layout.
    residual (optional): (N, OH, OW, Cout) f32, added before the final ReLU.
    """
    n, h, w, cin = x.shape
    cout, _, kh, kw = conv_w.shape
    oh = (h + 2 * padding - kh) // stride + 1
    ow = (w + 2 * padding - kw) // stride + 1

    # --- fold eval-mode BN into conv weight & bias (JAX glue) ---
    scale = bn["gamma"] / jnp.sqrt(bn["var"] + eps)            # (Cout,)
    w_f = conv_w * scale[:, None, None, None]                  # (Cout,Cin,kh,kw)
    b_f = bn["beta"] - bn["mean"] * scale                      # (Cout,)

    # --- im2col (JAX glue: pad + kh*kw strided slices) ---
    xp = x
    if padding:
        xp = jnp.pad(x, ((0, 0), (padding, padding), (padding, padding), (0, 0)))
    cols = [
        xp[:, dy:dy + stride * (oh - 1) + 1:stride,
              dx:dx + stride * (ow - 1) + 1:stride, :]
        for dy in range(kh) for dx in range(kw)
    ]
    patches = jnp.concatenate(cols, axis=-1).reshape(n * oh * ow, kh * kw * cin)
    # weight -> (kh,kw,Cin,Cout) -> (kh*kw*Cin, Cout), matching patch order (dy,dx,ci)
    wmat = jnp.transpose(w_f, (2, 3, 1, 0)).reshape(kh * kw * cin, cout)

    m, kdim = patches.shape
    kp, tk, grid_k = _choose_k_tiling(kdim, cout)
    if kp != kdim:  # zero-pad K so every tile is lane-aligned (zeros add nothing)
        patches = jnp.pad(patches, ((0, 0), (0, kp - kdim)))
        wmat = jnp.pad(wmat, ((0, kp - kdim), (0, 0)))

    # bf16 streaming of the big operands (f32 accumulate on the MXU).
    patches = patches.astype(jnp.bfloat16)
    wmat = wmat.astype(jnp.bfloat16)
    bias2d = b_f.reshape(1, cout).astype(jnp.float32)

    in_specs = [
        pl.BlockSpec((m, tk), lambda k: (0, k)),      # patches: full M, K-tiled
        pl.BlockSpec((tk, cout), lambda k: (k, 0)),   # weights: K-tiled, full Cout
        pl.BlockSpec((1, cout), lambda k: (0, 0)),    # bias
    ]
    args = [patches, wmat, bias2d]
    bytes_accessed = m * kp * 2 + kp * cout * 2 + cout * 4 + m * cout * 4

    if residual is not None:
        res2d = residual.reshape(m, cout).astype(jnp.float32)
        in_specs.append(pl.BlockSpec((m, cout), lambda k: (0, 0)))
        args.append(res2d)
        kernel = _mm_bias_res_relu_kernel
        bytes_accessed += m * cout * 4
    else:
        kernel = functools.partial(_mm_bias_act_kernel, relu=relu)

    out = pl.pallas_call(
        kernel,
        out_shape=jax.ShapeDtypeStruct((m, cout), jnp.float32),
        grid_spec=pltpu.PrefetchScalarGridSpec(
            num_scalar_prefetch=0,
            grid=(grid_k,),
            in_specs=in_specs,
            out_specs=pl.BlockSpec((m, cout), lambda k: (0, 0)),
            scratch_shapes=[pltpu.VMEM((m, cout), jnp.float32)],
        ),
        compiler_params=pltpu.CompilerParams(
            dimension_semantics=("arbitrary",),
            vmem_limit_bytes=32 * 1024 * 1024,
        ),
        cost_estimate=pl.CostEstimate(
            flops=2 * m * kp * cout,
            transcendentals=0,
            bytes_accessed=bytes_accessed,
        ),
    )(*args)
    return out.reshape(n, oh, ow, cout)


# -----------------------------------------------------------------------------
# MaxPool2d(kernel=3, stride=2, padding=1) -- plain JAX (fused by XLA; per perf review)
# -----------------------------------------------------------------------------
def maxpool3x3_s2_p1(x):
    return jax.lax.reduce_window(
        x, -jnp.inf, jax.lax.max,
        window_dimensions=(1, 3, 3, 1),
        window_strides=(1, 2, 2, 1),
        padding=((0, 0), (1, 1), (1, 1), (0, 0)),
    )


# -----------------------------------------------------------------------------
# BasicBlock / layers / ExpertCla_down composition
# -----------------------------------------------------------------------------
def basic_block_apply(x, p):
    identity = x
    out = conv_bn_act(x, p["w1"], p["bn1"], stride=p["stride"], padding=1, relu=True)
    if "wd" in p:  # conv1x1(stride) + BN downsample of the identity path
        identity = conv_bn_act(x, p["wd"], p["bnd"], stride=p["stride"],
                               padding=0, relu=False)
    # second conv: bias + residual add + ReLU fused into the matmul epilogue
    out = conv_bn_act(out, p["w2"], p["bn2"], stride=1, padding=1,
                      relu=True, residual=identity)
    return out


def expert_cla_down_forward(x, params):
    x = conv_bn_act(x, params["conv1"], params["bn1"], stride=2, padding=3, relu=True)
    x = maxpool3x3_s2_p1(x)
    for bp in params["layer1"]:
        x = basic_block_apply(x, bp)
    for bp in params["layer2"]:
        x = basic_block_apply(x, bp)
    return x


# -----------------------------------------------------------------------------
# Deterministic parameter initialization (mirrors the PyTorch module's init)
# -----------------------------------------------------------------------------
def _conv_init(key, cout, cin, kh, kw):
    n = kh * kw * cout
    return jax.random.normal(key, (cout, cin, kh, kw), jnp.float32) * jnp.sqrt(2.0 / n)


def _bn_init(cout):
    return dict(gamma=jnp.ones((cout,), jnp.float32),
                beta=jnp.zeros((cout,), jnp.float32),
                mean=jnp.zeros((cout,), jnp.float32),
                var=jnp.ones((cout,), jnp.float32))


def init_basic_block(key, inplanes, planes, stride=1, downsample=False):
    k1, k2, kd = jax.random.split(key, 3)
    p = dict(stride=stride,
             w1=_conv_init(k1, planes, inplanes, 3, 3), bn1=_bn_init(planes),
             w2=_conv_init(k2, planes, planes, 3, 3), bn2=_bn_init(planes))
    if downsample:
        p["wd"] = _conv_init(kd, planes, inplanes, 1, 1)
        p["bnd"] = _bn_init(planes)
    return p


def init_layer(key, inplanes, planes, blocks, stride=1):
    keys = jax.random.split(key, blocks)
    downsample = (stride != 1) or (inplanes != planes)   # BasicBlock.expansion == 1
    layer = [init_basic_block(keys[0], inplanes, planes, stride, downsample)]
    for i in range(1, blocks):
        layer.append(init_basic_block(keys[i], planes, planes, 1, False))
    return layer, planes


def init_expert_cla_down(key, layers=(2, 2)):
    kc, k1, k2 = jax.random.split(key, 3)
    params = dict(conv1=_conv_init(kc, 64, 3, 7, 7), bn1=_bn_init(64))
    inplanes = 64
    params["layer1"], inplanes = init_layer(k1, inplanes, 64, layers[0], 1)
    params["layer2"], inplanes = init_layer(k2, inplanes, 128, layers[1], 2)
    return params


# -----------------------------------------------------------------------------
if __name__ == "__main__":
    key = jax.random.PRNGKey(0)
    kp, kx = jax.random.split(key)

    params = init_expert_cla_down(kp, layers=(2, 2))

    # NHWC input; NCHW torch-equivalent shape: (2, 3, 32, 32)
    x = jax.random.normal(kx, (2, 32, 32, 3), jnp.float32)

    out = expert_cla_down_forward(x, params)
    out = jax.block_until_ready(out)

    # conv1 s2: 32->16, maxpool s2: 16->8, layer1: 8, layer2 s2: 8->4, Cout=128
    assert out.shape == (2, 4, 4, 128), out.shape
    assert bool(jnp.all(jnp.isfinite(out)))

    print("KERNEL_OK")
</pallas_src>

<mosaic_0001>
module attributes {stable_mosaic.version = 11 : i64} {
  func.func @_mm_bias_act_kernel(%arg0: i32, %arg1: memref<512x256xbf16, #tpu.memory_space<vmem>>, %arg2: memref<256x64xbf16, #tpu.memory_space<vmem>>, %arg3: memref<1x64xf32, #tpu.memory_space<vmem>>, %arg4: memref<512x64xf32, #tpu.memory_space<vmem>>, %arg5: memref<512x64xf32, #tpu.memory_space<vmem>>) attributes {dimension_semantics = [#tpu.dimension_semantics<arbitrary>], iteration_bounds = array<i64: 1>, scalar_prefetch = 0 : i64, scratch_operands = 1 : i64, tpu.core_type = #tpu.core_type<tc>, window_params = [{transform_indices = @transform_0, window_bounds = array<i64: 512, 256>}, {transform_indices = @transform_1, window_bounds = array<i64: 256, 64>}, {pipeline_mode = #tpu.pipeline_mode<synchronous>, transform_indices = @transform_2, window_bounds = array<i64: 1, 64>}, {pipeline_mode = #tpu.pipeline_mode<synchronous>, transform_indices = @transform_3, window_bounds = array<i64: 512, 64>}]} {
    %c0_i32 = arith.constant 0 : i32
    %0 = arith.cmpi eq, %arg0, %c0_i32 : i32
    %1 = arith.extui %0 : i1 to i32
    %c0_i32_0 = arith.constant 0 : i32
    %2 = arith.cmpi ne, %1, %c0_i32_0 : i32
    scf.if %2 {
      %cst_10 = arith.constant 0.000000e+00 : f32
      %12 = vector.broadcast %cst_10 : f32 to vector<512x64xf32>
      %c0_11 = arith.constant 0 : index
      %c0_12 = arith.constant 0 : index
      %13 = vector.load %arg5[%c0_11, %c0_12] : memref<512x64xf32, #tpu.memory_space<vmem>>, vector<512x64xf32>
      tpu.vector_store %arg5[%c0_11, %c0_12], %12 {strides = array<i32>} : memref<512x64xf32, #tpu.memory_space<vmem>>, vector<512x64xf32>,
    } else {
    }
    %c0 = arith.constant 0 : index
    %c0_1 = arith.constant 0 : index
    %3 = vector.load %arg5[%c0, %c0_1] : memref<512x64xf32, #tpu.memory_space<vmem>>, vector<512x64xf32>
    %c0_2 = arith.constant 0 : index
    %c0_3 = arith.constant 0 : index
    %4 = vector.load %arg1[%c0_2, %c0_3] : memref<512x256xbf16, #tpu.memory_space<vmem>>, vector<512x256xbf16>
    %c0_4 = arith.constant 0 : index
    %c0_5 = arith.constant 0 : index
    %5 = vector.load %arg2[%c0_4, %c0_5] : memref<256x64xbf16, #tpu.memory_space<vmem>>, vector<256x64xbf16>
    %cst = arith.constant dense<0.000000e+00> : vector<512x64xf32>
    %6 = tpu.matmul %4, %5, %cst {dimension_numbers = #tpu.dot_dimension_numbers<[1], [0], [0], [1], [0, 0, 1, 1], [], []>} : vector<512x256xbf16>, vector<256x64xbf16>, vector<512x64xf32> -> vector<512x64xf32>
    %7 = arith.addf %3, %6 : vector<512x64xf32>
    %c0_6 = arith.constant 0 : index
    %c0_7 = arith.constant 0 : index
    %8 = vector.load %arg5[%c0_6, %c0_7] : memref<512x64xf32, #tpu.memory_space<vmem>>, vector<512x64xf32>
    tpu.vector_store %arg5[%c0_6, %c0_7], %7 {strides = array<i32>} : memref<512x64xf32, #tpu.memory_space<vmem>>, vector<512x64xf32>,
    %c0_i32_8 = arith.constant 0 : i32
    %9 = arith.cmpi eq, %arg0, %c0_i32_8 : i32
    %10 = arith.extui %9 : i1 to i32
    %c0_i32_9 = arith.constant 0 : i32
    %11 = arith.cmpi ne, %10, %c0_i32_9 : i32
    scf.if %11 {
      %c0_10 = arith.constant 0 : index
      %c0_11 = arith.constant 0 : index
      %12 = vector.load %arg5[%c0_10, %c0_11] : memref<512x64xf32, #tpu.memory_space<vmem>>, vector<512x64xf32>
      %c0_12 = arith.constant 0 : index
      %c0_13 = arith.constant 0 : index
      %13 = vector.load %arg3[%c0_12, %c0_13] : memref<1x64xf32, #tpu.memory_space<vmem>>, vector<1x64xf32>
      %14 = vector.broadcast %13 : vector<1x64xf32> to vector<512x64xf32>
      %15 = arith.addf %12, %14 : vector<512x64xf32>
      %cst_14 = arith.constant 0.000000e+00 : f32
      %16 = vector.broadcast %cst_14 : f32 to vector<512x64xf32>
      %17 = arith.maximumf %15, %16 : vector<512x64xf32>
      %c0_15 = arith.constant 0 : index
      %c0_16 = arith.constant 0 : index
      %18 = vector.load %arg4[%c0_15, %c0_16] : memref<512x64xf32, #tpu.memory_space<vmem>>, vector<512x64xf32>
      tpu.vector_store %arg4[%c0_15, %c0_16], %17 {strides = array<i32>} : memref<512x64xf32, #tpu.memory_space<vmem>>, vector<512x64xf32>,
    } else {
    }
    return
  }
  func.func @transform_0(%arg0: i32) -> (i32, i32) {
    %c0_i32 = arith.constant 0 : i32
    %c0_i32_0 = arith.constant 0 : i32
    return %c0_i32, %arg0 : i32, i32
  }
  func.func @transform_1(%arg0: i32) -> (i32, i32) {
    %c0_i32 = arith.constant 0 : i32
    %c0_i32_0 = arith.constant 0 : i32
    return %arg0, %c0_i32 : i32, i32
  }
  func.func @transform_2(%arg0: i32) -> (i32, i32) {
    %c0_i32 = arith.constant 0 : i32
    %c0_i32_0 = arith.constant 0 : i32
    %c0_i32_1 = arith.constant 0 : i32
    return %c0_i32, %c0_i32_0 : i32, i32
  }
  func.func @transform_3(%arg0: i32) -> (i32, i32) {
    %c0_i32 = arith.constant 0 : i32
    %c0_i32_0 = arith.constant 0 : i32
    %c0_i32_1 = arith.constant 0 : i32
    return %c0_i32, %c0_i32_0 : i32, i32
  }
}

</mosaic_0001>

<bundles_post_ra>
// kernel: tpu_custom_call.1
= control target key start
LH: loop header
LB: loop body
LE: loop exit
PB: predicated region body
PF: predicated region fallthrough
CT: control target
= control target key end

     0   :  { %8 = vsyncpa [#allocation4], 0  ;;  %s1618_s12 = smov [#allocation3]   ;;  %s2251_s0 = inlined_call_operand.hbm [shape: bf16[512,256], index: 0, kind: input, shape index: {}]   ;;  %s2252_s1 = inlined_call_operand.vmem [shape: bf16[256,64], index: 1, kind: input, shape index: {}]   ;;  %s2253_s2 = inlined_call_operand.vmem [shape: f32[1,64], index: 2, kind: input, shape index: {}]   ;;  %s2254_s3 = inlined_call_operand.vmem [shape: f32[512,64], index: 3, kind: output, shape index: {}]  }
   0x1   :  { %s14_s13 = sshll.u32 %s1618_s12, 4  ;;  %s1594_s16 = scalar_lea.hbm %s2251_s0, 8192  ;;  %s15_s13 = int_to_ptr.vmem [resolvable:$true] %s14_s13 }
   0x2   :  { %p1595_p0 = scmp.ne.s32.totalorder %s2251_s0, %s1594_s16  ;;  %p1598_p1 = scmp.lt.u32.totalorder %s1594_s16, %s2251_s0 }
   0x4   :  { %p1600_p2 = pnand %p1598_p1, %p1595_p0 }
   0x6   :  { %1603 = shalt.err (!%p1600_p2)
}
   0x7   :  { %s1604_s21 = scalar_lea.vmem %s15_s13, 8192  ;;  %p1609_p4 = scmp.lt.s32.totalorder %s15_s13, %s15_s13 }
   0x8   :  { %p1605_p3 = scmp.ne.s32.totalorder %s15_s13, %s1604_s21  ;;  %p1610_p5 = scmp.lt.s32.totalorder %s1604_s21, %s1604_s21 }
   0xa   :  { %p1611_p6 = por %p1610_p5, %p1609_p4 }
   0xc   :  { %p1612_p7 = pnand %p1611_p6, %p1605_p3 }
   0xe   :  { %1615 = shalt.err (!%p1612_p7)
}
   0xf   :  { %s1619_s22 = smov 128   ;;  %s1620_s23 = smov 8  }
  0x10   :  { %20 = dma.hbm_to_vmem [thread:$0]  %s2251_s0, 8192, %s15_s13, [#allocation4], %s1619_s22, %s1619_s22, %s1620_s23  }
  0x11   :  { %1616 = dma.done.wait [#allocation4], 8192  }
  0x12   :  { %1617 = vsyncadd [#allocation4], 4294959104  ;;  %v1621_v0 = vmov 0   ;;  %v1481_v1 = vld [vmem:[%s2252_s1] sm:$0xff]   ;;  %v1482_v2 = vld [vmem:[%s2252_s1 + $0x8] sm:$0xff]   ;;  %vm33_vm0 = vcmask 523264  }
  0x13   :  { %674 = vmatprep.subr.bf16.mxu0 %v1621_v0  ;;  %1444 = vmatprep.subr.bf16.mxu1 %v1621_v0  ;;  %v1483_v3 = vld [vmem:[%s2252_s1 + $0x10] sm:$0xff]   ;;  %v1484_v4 = vld [vmem:[%s2252_s1 + $0x18] sm:$0xff]   ;;  %v1485_v5 = vld [vmem:[%s2252_s1 + $0x20] sm:$0xff]   ;;  %v1622_v19 = vmov 0.0  }
  0x14   :  { %675 = vmatpush1.bf16.msra.mxu0 %v1481_v1  ;;  %1460 = vmatpush1.bf16.msra.mxu1 %v1481_v1  ;;  %v1499_v6 = vld [vmem:[#allocation3 + $0x4] ss:$8 sps:$4 sm:$0xff]   ;;  %v1487_v9 = vld [vmem:[%s2252_s1 + $0x30] sm:$0xff]   ;;  %v1488_v10 = vld [vmem:[%s2252_s1 + $0x38] sm:$0xff]   ;;  %34 = vst.msk [vmem:[#allocation2] sm:$0xff] %vm33_vm0, %v1622_v19 }
  0x15   :  { %676 = vmatprep.subr.bf16.mxu0 %v1621_v0  ;;  %1445 = vmatprep.subr.bf16.mxu1 %v1621_v0  ;;  %v1486_v7 = vld [vmem:[%s2252_s1 + $0x28] sm:$0xff]   ;;  %v1489_v11 = vld [vmem:[%s2252_s1 + $0x40] sm:$0xff]   ;;  %v1491_v13 = vld [vmem:[%s2252_s1 + $0x50] sm:$0xff]   ;;  %35 = vst.msk [vmem:[#allocation2 + $0x8] sm:$0xff] %vm33_vm0, %v1622_v19 }
  0x16   :  { %v1502_v8 = vld [vmem:[#allocation3 + $0x104] ss:$8 sps:$4 sm:$0xff]   ;;  %706 = vmatprep.mubr.bf16.mxu0 %v1499_v6  ;;  %v1492_v14 = vld [vmem:[%s2252_s1 + $0x58] sm:$0xff]   ;;  %v1495_v17 = vld [vmem:[%s2252_s1 + $0x70] sm:$0xff]   ;;  %36 = vst.msk [vmem:[#allocation2 + $0x10] sm:$0xff] %vm33_vm0, %v1622_v19 }
  0x17   :  { %834 = vmatprep.mubr.bf16.mxu1 %v1502_v8  ;;  %v1490_v12 = vld [vmem:[%s2252_s1 + $0x48] sm:$0xff]   ;;  %v1493_v15 = vld [vmem:[%s2252_s1 + $0x60] sm:$0xff]   ;;  %v1733_v18 = vld [vmem:[%s2252_s1 + $0x78] sm:$0xff]   ;;  %37 = vst.msk [vmem:[#allocation2 + $0x18] sm:$0xff] %vm33_vm0, %v1622_v19 }
  0x18   :  { %677 = vmatpush1.bf16.msra.mxu0 %v1482_v2  ;;  %1461 = vmatpush1.bf16.msra.mxu1 %v1482_v2  ;;  %v1494_v16 = vld [vmem:[%s2252_s1 + $0x68] sm:$0xff]   ;;  %38 = vst.msk [vmem:[#allocation2 + $0x20] sm:$0xff] %vm33_vm0, %v1622_v19  ;;  %39 = vst.msk [vmem:[#allocation2 + $0x28] sm:$0xff] %vm33_vm0, %v1622_v19  ;;  %v1503_v22 = vld [vmem:[#allocation3 + $0x14] ss:$8 sps:$4 sm:$0xff]  }
  0x19   :  { %678 = vmatprep.subr.bf16.mxu0 %v1621_v0  ;;  %1446 = vmatprep.subr.bf16.mxu1 %v1621_v0  ;;  %40 = vst.msk [vmem:[#allocation2 + $0x30] sm:$0xff] %vm33_vm0, %v1622_v19  ;;  %41 = vst.msk [vmem:[#allocation2 + $0x38] sm:$0xff] %vm33_vm0, %v1622_v19  ;;  %v1497_v20 = vld [vmem:[#allocation3] ss:$8 sps:$4 sm:$0xff]   ;;  %v1505_v23 = vld [vmem:[#allocation3 + $0x114] ss:$8 sps:$4 sm:$0xff]  }
  0x1a   :  { %42 = vst.msk [vmem:[#allocation2 + $0x40] sm:$0xff] %vm33_vm0, %v1622_v19  ;;  %43 = vst.msk [vmem:[#allocation2 + $0x48] sm:$0xff] %vm33_vm0, %v1622_v19  ;;  %v1500_v21 = vld [vmem:[#allocation3 + $0x100] ss:$8 sps:$4 sm:$0xff]   ;;  %v1507_v24 = vld [vmem:[#allocation3 + $0x10] ss:$8 sps:$4 sm:$0xff]  }
  0x1b   :  { %44 = vst.msk [vmem:[#allocation2 + $0x50] sm:$0xff] %vm33_vm0, %v1622_v19  ;;  %45 = vst.msk [vmem:[#allocation2 + $0x58] sm:$0xff] %vm33_vm0, %v1622_v19  ;;  %v1508_v25 = vld [vmem:[#allocation3 + $0x110] ss:$8 sps:$4 sm:$0xff]   ;;  %v1509_v26 = vld [vmem:[#allocation3 + $0x24] ss:$8 sps:$4 sm:$0xff]  }
  0x1c   :  { %679 = vmatpush1.bf16.msra.mxu0 %v1483_v3  ;;  %1462 = vmatpush1.bf16.msra.mxu1 %v1483_v3  ;;  %46 = vst.msk [vmem:[#allocation2 + $0x60] sm:$0xff] %vm33_vm0, %v1622_v19  ;;  %47 = vst.msk [vmem:[#allocation2 + $0x68] sm:$0xff] %vm33_vm0, %v1622_v19  ;;  %v1511_v27 = vld [vmem:[#allocation3 + $0x124] ss:$8 sps:$4 sm:$0xff]   ;;  %v1513_v28 = vld [vmem:[#allocation3 + $0x20] ss:$8 sps:$4 sm:$0xff]  }
  0x1d   :  { %680 = vmatprep.subr.bf16.mxu0 %v1621_v0  ;;  %1447 = vmatprep.subr.bf16.mxu1 %v1621_v0  ;;  %48 = vst.msk [vmem:[#allocation2 + $0x70] sm:$0xff] %vm33_vm0, %v1622_v19  ;;  %49 = vst.msk [vmem:[#allocation2 + $0x78] sm:$0xff] %vm33_vm0, %v1622_v19  ;;  %v1514_v29 = vld [vmem:[#allocation3 + $0x120] ss:$8 sps:$4 sm:$0xff]   ;;  %v1515_v30 = vld [vmem:[#allocation3 + $0x34] ss:$8 sps:$4 sm:$0xff]  }
  0x1e   :  { %50 = vst.msk [vmem:[#allocation2 + $0x80] sm:$0xff] %vm33_vm0, %v1622_v19  ;;  %51 = vst.msk [vmem:[#allocation2 + $0x88] sm:$0xff] %vm33_vm0, %v1622_v19  ;;  %v1517_v31 = vld [vmem:[#allocation3 + $0x134] ss:$8 sps:$4 sm:$0xff]   ;;  %v1519_v32 = vld [vmem:[#allocation3 + $0x30] ss:$8 sps:$4 sm:$0xff]  }
  0x1f   :  { %52 = vst.msk [vmem:[#allocation2 + $0x90] sm:$0xff] %vm33_vm0, %v1622_v19  ;;  %53 = vst.msk [vmem:[#allocation2 + $0x98] sm:$0xff] %vm33_vm0, %v1622_v19  ;;  %v1520_v33 = vld [vmem:[#allocation3 + $0x130] ss:$8 sps:$4 sm:$0xff]   ;;  %v1521_v34 = vld [vmem:[#allocation3 + $0x44] ss:$8 sps:$4 sm:$0xff]  }
  0x20   :  { %681 = vmatpush1.bf16.msra.mxu0 %v1484_v4  ;;  %1463 = vmatpush1.bf16.msra.mxu1 %v1484_v4  ;;  %54 = vst.msk [vmem:[#allocation2 + $0xa0] sm:$0xff] %vm33_vm0, %v1622_v19  ;;  %55 = vst.msk [vmem:[#allocation2 + $0xa8] sm:$0xff] %vm33_vm0, %v1622_v19  ;;  %v1523_v35 = vld [vmem:[#allocation3 + $0x144] ss:$8 sps:$4 sm:$0xff]   ;;  %v1525_v36 = vld [vmem:[#allocation3 + $0x40] ss:$8 sps:$4 sm:$0xff]  }
  0x21   :  { %682 = vmatprep.subr.bf16.mxu0 %v1621_v0  ;;  %1448 = vmatprep.subr.bf16.mxu1 %v1621_v0  ;;  %56 = vst.msk [vmem:[#allocation2 + $0xb0] sm:$0xff] %vm33_vm0, %v1622_v19  ;;  %57 = vst.msk [vmem:[#allocation2 + $0xb8] sm:$0xff] %vm33_vm0, %v1622_v19  ;;  %v1526_v37 = vld [vmem:[#allocation3 + $0x140] ss:$8 sps:$4 sm:$0xff]   ;;  %v1527_v38 = vld [vmem:[#allocation3 + $0x54] ss:$8 sps:$4 sm:$0xff]  }
  0x22   :  { %58 = vst.msk [vmem:[#allocation2 + $0xc0] sm:$0xff] %vm33_vm0, %v1622_v19  ;;  %59 = vst.msk [vmem:[#allocation2 + $0xc8] sm:$0xff] %vm33_vm0, %v1622_v19  ;;  %v1529_v39 = vld [vmem:[#allocation3 + $0x154] ss:$8 sps:$4 sm:$0xff]   ;;  %v1531_v40 = vld [vmem:[#allocation3 + $0x50] ss:$8 sps:$4 sm:$0xff]  }
  0x23   :  { %60 = vst.msk [vmem:[#allocation2 + $0xd0] sm:$0xff] %vm33_vm0, %v1622_v19  ;;  %61 = vst.msk [vmem:[#allocation2 + $0xd8] sm:$0xff] %vm33_vm0, %v1622_v19  ;;  %v1532_v41 = vld [vmem:[#allocation3 + $0x150] ss:$8 sps:$4 sm:$0xff]   ;;  %v1533_v42 = vld [vmem:[#allocation3 + $0x64] ss:$8 sps:$4 sm:$0xff]  }
  0x24   :  { %683 = vmatpush1.bf16.msra.mxu0 %v1485_v5  ;;  %1464 = vmatpush1.bf16.msra.mxu1 %v1485_v5  ;;  %62 = vst.msk [vmem:[#allocation2 + $0xe0] sm:$0xff] %vm33_vm0, %v1622_v19  ;;  %63 = vst.msk [vmem:[#allocation2 + $0xe8] sm:$0xff] %vm33_vm0, %v1622_v19  ;;  %v1535_v43 = vld [vmem:[#allocation3 + $0x164] ss:$8 sps:$4 sm:$0xff]   ;;  %v1537_v44 = vld [vmem:[#allocation3 + $0x60] ss:$8 sps:$4 sm:$0xff]  }
  0x25   :  { %684 = vmatprep.subr.bf16.mxu0 %v1621_v0  ;;  %1449 = vmatprep.subr.bf16.mxu1 %v1621_v0  ;;  %64 = vst.msk [vmem:[#allocation2 + $0xf0] sm:$0xff] %vm33_vm0, %v1622_v19  ;;  %65 = vst.msk [vmem:[#allocation2 + $0xf8] sm:$0xff] %vm33_vm0, %v1622_v19  ;;  %v1538_v45 = vld [vmem:[#allocation3 + $0x160] ss:$8 sps:$4 sm:$0xff]   ;;  %v1539_v46 = vld [vmem:[#allocation3 + $0x74] ss:$8 sps:$4 sm:$0xff]  }
  0x26   :  { %66 = vst.msk [vmem:[#allocation2 + $0x100] sm:$0xff] %vm33_vm0, %v1622_v19  ;;  %67 = vst.msk [vmem:[#allocation2 + $0x108] sm:$0xff] %vm33_vm0, %v1622_v19  ;;  %v1541_v47 = vld [vmem:[#allocation3 + $0x174] ss:$8 sps:$4 sm:$0xff]   ;;  %v1543_v48 = vld [vmem:[#allocation3 + $0x70] ss:$8 sps:$4 sm:$0xff]  }
  0x27   :  { %68 = vst.msk [vmem:[#allocation2 + $0x110] sm:$0xff] %vm33_vm0, %v1622_v19  ;;  %69 = vst.msk [vmem:[#allocation2 + $0x118] sm:$0xff] %vm33_vm0, %v1622_v19  ;;  %v1544_v49 = vld [vmem:[#allocation3 + $0x170] ss:$8 sps:$4 sm:$0xff]   ;;  %v1545_v50 = vld [vmem:[#allocation3 + $0x84] ss:$8 sps:$4 sm:$0xff]  }
  0x28   :  { %685 = vmatpush1.bf16.msra.mxu0 %v1486_v7  ;;  %1465 = vmatpush1.bf16.msra.mxu1 %v1486_v7  ;;  %70 = vst.msk [vmem:[#allocation2 + $0x120] sm:$0xff] %vm33_vm0, %v1622_v19  ;;  %71 = vst.msk [vmem:[#allocation2 + $0x128] sm:$0xff] %vm33_vm0, %v1622_v19  ;;  %v1547_v51 = vld [vmem:[#allocation3 + $0x184] ss:$8 sps:$4 sm:$0xff]   ;;  %v1549_v52 = vld [vmem:[#allocation3 + $0x80] ss:$8 sps:$4 sm:$0xff]  }
  0x29   :  { %686 = vmatprep.subr.bf16.mxu0 %v1621_v0  ;;  %1450 = vmatprep.subr.bf16.mxu1 %v1621_v0  ;;  %72 = vst.msk [vmem:[#allocation2 + $0x130] sm:$0xff] %vm33_vm0, %v1622_v19  ;;  %73 = vst.msk [vmem:[#allocation2 + $0x138] sm:$0xff] %vm33_vm0, %v1622_v19  ;;  %v1550_v53 = vld [vmem:[#allocation3 + $0x180] ss:$8 sps:$4 sm:$0xff]   ;;  %v1551_v54 = vld [vmem:[#allocation3 + $0x94] ss:$8 sps:$4 sm:$0xff]  }
  0x2a   :  { %74 = vst.msk [vmem:[#allocation2 + $0x140] sm:$0xff] %vm33_vm0, %v1622_v19  ;;  %75 = vst.msk [vmem:[#allocation2 + $0x148] sm:$0xff] %vm33_vm0, %v1622_v19  ;;  %v1553_v55 = vld [vmem:[#allocation3 + $0x194] ss:$8 sps:$4 sm:$0xff]   ;;  %v1555_v56 = vld [vmem:[#allocation3 + $0x90] ss:$8 sps:$4 sm:$0xff]  }
  0x2b   :  { %76 = vst.msk [vmem:[#allocation2 + $0x150] sm:$0xff] %vm33_vm0, %v1622_v19  ;;  %77 = vst.msk [vmem:[#allocation2 + $0x158] sm:$0xff] %vm33_vm0, %v1622_v19  ;;  %v1556_v57 = vld [vmem:[#allocation3 + $0x190] ss:$8 sps:$4 sm:$0xff]   ;;  %v1557_v58 = vld [vmem:[#allocation3 + $0xa4] ss:$8 sps:$4 sm:$0xff]  }
  0x2c   :  { %687 = vmatpush1.bf16.msra.mxu0 %v1487_v9  ;;  %1466 = vmatpush1.bf16.msra.mxu1 %v1487_v9  ;;  %78 = vst.msk [vmem:[#allocation2 + $0x160] sm:$0xff] %vm33_vm0, %v1622_v19  ;;  %79 = vst.msk [vmem:[#allocation2 + $0x168] sm:$0xff] %vm33_vm0, %v1622_v19  ;;  %v1559_v59 = vld [vmem:[#allocation3 + $0x1a4] ss:$8 sps:$4 sm:$0xff]   ;;  %v1561_v60 = vld [vmem:[#allocation3 + $0xa0] ss:$8 sps:$4 sm:$0xff]  }
  0x2d   :  { %688 = vmatprep.subr.bf16.mxu0 %v1621_v0  ;;  %1451 = vmatprep.subr.bf16.mxu1 %v1621_v0  ;;  %80 = vst.msk [vmem:[#allocation2 + $0x170] sm:$0xff] %vm33_vm0, %v1622_v19  ;;  %81 = vst.msk [vmem:[#allocation2 + $0x178] sm:$0xff] %vm33_vm0, %v1622_v19  ;;  %v1562_v61 = vld [vmem:[#allocation3 + $0x1a0] ss:$8 sps:$4 sm:$0xff]   ;;  %v1563_v62 = vld [vmem:[#allocation3 + $0xb4] ss:$8 sps:$4 sm:$0xff]  }
  0x2e   :  { %82 = vst.msk [vmem:[#allocation2 + $0x180] sm:$0xff] %vm33_vm0, %v1622_v19  ;;  %83 = vst.msk [vmem:[#allocation2 + $0x188] sm:$0xff] %vm33_vm0, %v1622_v19  ;;  %v1565_v63 = vld [vmem:[#allocation3 + $0x1b4] ss:$8 sps:$4 sm:$0xff]   ;;  %v1568_v1 = vld [vmem:[#allocation3 + $0x1b0] ss:$8 sps:$4 sm:$0xff]  }
  0x2f   :  { %84 = vst.msk [vmem:[#allocation2 + $0x190] sm:$0xff] %vm33_vm0, %v1622_v19  ;;  %85 = vst.msk [vmem:[#allocation2 + $0x198] sm:$0xff] %vm33_vm0, %v1622_v19  ;;  %v1569_v2 = vld [vmem:[#allocation3 + $0xc4] ss:$8 sps:$4 sm:$0xff]   ;;  %v1573_v4 = vld [vmem:[#allocation3 + $0xc0] ss:$8 sps:$4 sm:$0xff]  }
  0x30   :  { %689 = vmatpush1.bf16.msra.mxu0 %v1488_v10  ;;  %1467 = vmatpush1.bf16.msra.mxu1 %v1488_v10  ;;  %86 = vst.msk [vmem:[#allocation2 + $0x1a0] sm:$0xff] %vm33_vm0, %v1622_v19  ;;  %87 = vst.msk [vmem:[#allocation2 + $0x1a8] sm:$0xff] %vm33_vm0, %v1622_v19  ;;  %v1571_v3 = vld [vmem:[#allocation3 + $0x1c4] ss:$8 sps:$4 sm:$0xff]   ;;  %v1574_v5 = vld [vmem:[#allocation3 + $0x1c0] ss:$8 sps:$4 sm:$0xff]  }
  0x31   :  { %690 = vmatprep.subr.bf16.mxu0 %v1621_v0  ;;  %1452 = vmatprep.subr.bf16.mxu1 %v1621_v0  ;;  %88 = vst.msk [vmem:[#allocation2 + $0x1b0] sm:$0xff] %vm33_vm0, %v1622_v19  ;;  %89 = vst.msk [vmem:[#allocation2 + $0x1b8] sm:$0xff] %vm33_vm0, %v1622_v19  ;;  %v1575_v6 = vld [vmem:[#allocation3 + $0xd4] ss:$8 sps:$4 sm:$0xff]   ;;  %v1579_v8 = vld [vmem:[#allocation3 + $0xd0] ss:$8 sps:$4 sm:$0xff]  }
  0x32   :  { %90 = vst.msk [vmem:[#allocation2 + $0x1c0] sm:$0xff] %vm33_vm0, %v1622_v19  ;;  %91 = vst.msk [vmem:[#allocation2 + $0x1c8] sm:$0xff] %vm33_vm0, %v1622_v19  ;;  %v1577_v7 = vld [vmem:[#allocation3 + $0x1d4] ss:$8 sps:$4 sm:$0xff]   ;;  %v1580_v9 = vld [vmem:[#allocation3 + $0x1d0] ss:$8 sps:$4 sm:$0xff]  }
  0x33   :  { %92 = vst.msk [vmem:[#allocation2 + $0x1d0] sm:$0xff] %vm33_vm0, %v1622_v19  ;;  %93 = vst.msk [vmem:[#allocation2 + $0x1d8] sm:$0xff] %vm33_vm0, %v1622_v19  ;;  %v1581_v10 = vld [vmem:[#allocation3 + $0xe4] ss:$8 sps:$4 sm:$0xff]  }
  0x34   :  { %691 = vmatpush1.bf16.msra.mxu0 %v1489_v11  ;;  %1468 = vmatpush1.bf16.msra.mxu1 %v1489_v11  ;;  %94 = vst.msk [vmem:[#allocation2 + $0x1e0] sm:$0xff] %vm33_vm0, %v1622_v19  ;;  %95 = vst.msk [vmem:[#allocation2 + $0x1e8] sm:$0xff] %vm33_vm0, %v1622_v19  ;;  %v1583_v11 = vld [vmem:[#allocation3 + $0x1e4] ss:$8 sps:$4 sm:$0xff]  }
  0x35   :  { %692 = vmatprep.subr.bf16.mxu0 %v1621_v0  ;;  %1453 = vmatprep.subr.bf16.mxu1 %v1621_v0  ;;  %96 = vst.msk [vmem:[#allocation2 + $0x1f0] sm:$0xff] %vm33_vm0, %v1622_v19  ;;  %97 = vst.msk [vmem:[#allocation2 + $0x1f8] sm:$0xff] %vm33_vm0, %v1622_v19  ;;  %v130_v19 = vld [vmem:[#allocation2 + $0x100] sm:$0xff] }
  0x38   :  { %693 = vmatpush1.bf16.msra.mxu0 %v1490_v12  ;;  %1469 = vmatpush1.bf16.msra.mxu1 %v1490_v12  ;;  %v1585_v12 = vld [vmem:[#allocation3 + $0xe0] ss:$8 sps:$4 sm:$0xff]  }
  0x39   :  { %694 = vmatprep.subr.bf16.mxu0 %v1621_v0  ;;  %1454 = vmatprep.subr.bf16.mxu1 %v1621_v0 }
  0x3c   :  { %695 = vmatpush1.bf16.msra.mxu0 %v1491_v13  ;;  %1470 = vmatpush1.bf16.msra.mxu1 %v1491_v13  ;;  %v1586_v13 = vld [vmem:[#allocation3 + $0x1e0] ss:$8 sps:$4 sm:$0xff]  }
  0x3d   :  { %696 = vmatprep.subr.bf16.mxu0 %v1621_v0  ;;  %1455 = vmatprep.subr.bf16.mxu1 %v1621_v0 }
  0x40   :  { %697 = vmatpush1.bf16.msra.mxu0 %v1492_v14  ;;  %1471 = vmatpush1.bf16.msra.mxu1 %v1492_v14  ;;  %v1587_v14 = vld [vmem:[#allocation3 + $0xf4] ss:$8 sps:$4 sm:$0xff]  }
  0x41   :  { %698 = vmatprep.subr.bf16.mxu0 %v1621_v0  ;;  %1456 = vmatprep.subr.bf16.mxu1 %v1621_v0 }
  0x44   :  { %699 = vmatpush1.bf16.msra.mxu0 %v1493_v15  ;;  %1472 = vmatpush1.bf16.msra.mxu1 %v1493_v15  ;;  %v1589_v15 = vld [vmem:[#allocation3 + $0x1f4] ss:$8 sps:$4 sm:$0xff]  }
  0x45   :  { %700 = vmatprep.subr.bf16.mxu0 %v1621_v0  ;;  %1457 = vmatprep.subr.bf16.mxu1 %v1621_v0 }
  0x48   :  { %701 = vmatpush1.bf16.msra.mxu0 %v1494_v16  ;;  %1473 = vmatpush1.bf16.msra.mxu1 %v1494_v16  ;;  %v1591_v16 = vld [vmem:[#allocation3 + $0xf0] ss:$8 sps:$4 sm:$0xff]  }
  0x49   :  { %702 = vmatprep.subr.bf16.mxu0 %v1621_v0  ;;  %1458 = vmatprep.subr.bf16.mxu1 %v1621_v0 }
  0x4c   :  { %703 = vmatpush1.bf16.msra.mxu0 %v1495_v17  ;;  %1474 = vmatpush1.bf16.msra.mxu1 %v1495_v17  ;;  %v1592_v17 = vld [vmem:[#allocation3 + $0x1f0] ss:$8 sps:$4 sm:$0xff]  }
  0x4d   :  { %704 = vmatprep.subr.bf16.mxu0 %v1621_v0  ;;  %1459 = vmatprep.subr.bf16.mxu1 %v1621_v0  ;;  %v1567_v0 = vld [vmem:[#allocation3 + $0xb0] ss:$8 sps:$4 sm:$0xff]  }
  0x50   :  { %705 = vmatpush1.bf16.msra.mxu0 %v1733_v18  ;;  %1475 = vmatpush1.bf16.msra.mxu1 %v1733_v18  ;;  %v98_v18 = vld [vmem:[#allocation2] sm:$0xff] }
  0x53   :  { %707 = vmatmul.mubr.bf16.vlgmr.msra.gmra.mrb[0].mxu0 %v1497_v20  ;;  %835 = vmatmul.mubr.bf16.vlgmr.msra.gmra.mrb[0].mxu1 %v1500_v21 }
  0x54   :  { %714 = vmatprep.mubr.bf16.mxu0 %v1503_v22  ;;  %842 = vmatprep.mubr.bf16.mxu1 %v1505_v23  ;;  %v99_v22 = vld [vmem:[#allocation2 + $0x8] sm:$0xff] }
  0x55   :  { %v131_v23 = vld [vmem:[#allocation2 + $0x108] sm:$0xff] }
  0x5b   :  { %715 = vmatmul.mubr.bf16.gmra.mrb[4].mxu0 %v1507_v24  ;;  %843 = vmatmul.mubr.bf16.gmra.mrb[4].mxu1 %v1508_v25 }
  0x5c   :  { %722 = vmatprep.mubr.bf16.mxu0 %v1509_v26  ;;  %850 = vmatprep.mubr.bf16.mxu1 %v1511_v27 }
  0x63   :  { %723 = vmatmul.mubr.bf16.gmra.mrb[8].mxu0 %v1513_v28  ;;  %851 = vmatmul.mubr.bf16.gmra.mrb[8].mxu1 %v1514_v29 }
  0x64   :  { %730 = vmatprep.mubr.bf16.mxu0 %v1515_v30  ;;  %858 = vmatprep.mubr.bf16.mxu1 %v1517_v31 }
  0x6b   :  { %731 = vmatmul.mubr.bf16.gmra.mrb[12].mxu0 %v1519_v32  ;;  %859 = vmatmul.mubr.bf16.gmra.mrb[12].mxu1 %v1520_v33 }
  0x6c   :  { %738 = vmatprep.mubr.bf16.mxu0 %v1521_v34  ;;  %866 = vmatprep.mubr.bf16.mxu1 %v1523_v35  ;;  %v100_v34 = vld [vmem:[#allocation2 + $0x10] sm:$0xff] }
  0x6d   :  { %v132_v35 = vld [vmem:[#allocation2 + $0x110] sm:$0xff] }
  0x73   :  { %739 = vmatmul.mubr.bf16.gmra.mrb[16].mxu0 %v1525_v36  ;;  %867 = vmatmul.mubr.bf16.gmra.mrb[16].mxu1 %v1526_v37  ;;  %v1874_v36 = vld [vmem:[%s2253_s2] ss:$0 sm:$0xff] }
  0x74   :  { %746 = vmatprep.mubr.bf16.mxu0 %v1527_v38  ;;  %874 = vmatprep.mubr.bf16.mxu1 %v1529_v39  ;;  %v101_v39 = vld [vmem:[#allocation2 + $0x18] sm:$0xff] }
  0x7b   :  { %747 = vmatmul.mubr.bf16.gmra.mrb[20].mxu0 %v1531_v40  ;;  %875 = vmatmul.mubr.bf16.gmra.mrb[20].mxu1 %v1532_v41  ;;  %v133_v40 = vld [vmem:[#allocation2 + $0x118] sm:$0xff] }
  0x7c   :  { %754 = vmatprep.mubr.bf16.mxu0 %v1533_v42  ;;  %882 = vmatprep.mubr.bf16.mxu1 %v1535_v43 }
  0x83   :  { %755 = vmatmul.mubr.bf16.gmra.mrb[24].mxu0 %v1537_v44  ;;  %883 = vmatmul.mubr.bf16.gmra.mrb[24].mxu1 %v1538_v45 }
  0x84   :  { %762 = vmatprep.mubr.bf16.mxu0 %v1539_v46  ;;  %890 = vmatprep.mubr.bf16.mxu1 %v1541_v47 }
  0x8b   :  { %763 = vmatmul.mubr.bf16.gmra.mrb[28].mxu0 %v1543_v48  ;;  %891 = vmatmul.mubr.bf16.gmra.mrb[28].mxu1 %v1544_v49 }
  0x8c   :  { %770 = vmatprep.mubr.bf16.mxu0 %v1545_v50  ;;  %898 = vmatprep.mubr.bf16.mxu1 %v1547_v51 }
  0x93   :  { %771 = vmatmul.mubr.bf16.gmra.mrb[32].mxu0 %v1549_v52  ;;  %899 = vmatmul.mubr.bf16.gmra.mrb[32].mxu1 %v1550_v53 }
  0x94   :  { %778 = vmatprep.mubr.bf16.mxu0 %v1551_v54  ;;  %906 = vmatprep.mubr.bf16.mxu1 %v1553_v55 }
  0x9b   :  { %779 = vmatmul.mubr.bf16.gmra.mrb[36].mxu0 %v1555_v56  ;;  %907 = vmatmul.mubr.bf16.gmra.mrb[36].mxu1 %v1556_v57 }
  0x9c   :  { %786 = vmatprep.mubr.bf16.mxu0 %v1557_v58  ;;  %914 = vmatprep.mubr.bf16.mxu1 %v1559_v59 }
  0xa3   :  { %787 = vmatmul.mubr.bf16.gmra.mrb[40].mxu0 %v1561_v60  ;;  %915 = vmatmul.mubr.bf16.gmra.mrb[40].mxu1 %v1562_v61  ;;  %v102_v61 = vld [vmem:[#allocation2 + $0x20] sm:$0xff] }
  0xa4   :  { %794 = vmatprep.mubr.bf16.mxu0 %v1563_v62  ;;  %922 = vmatprep.mubr.bf16.mxu1 %v1565_v63  ;;  %v134_v62 = vld [vmem:[#allocation2 + $0x120] sm:$0xff] }
  0xab   :  { %795 = vmatmul.mubr.bf16.gmra.mrb[44].mxu0 %v1567_v0  ;;  %923 = vmatmul.mubr.bf16.gmra.mrb[44].mxu1 %v1568_v1 }
  0xac   :  { %802 = vmatprep.mubr.bf16.mxu0 %v1569_v2  ;;  %930 = vmatprep.mubr.bf16.mxu1 %v1571_v3  ;;  %v103_v3 = vld [vmem:[#allocation2 + $0x28] sm:$0xff] }
  0xb3   :  { %803 = vmatmul.mubr.bf16.gmra.mrb[48].mxu0 %v1573_v4  ;;  %931 = vmatmul.mubr.bf16.gmra.mrb[48].mxu1 %v1574_v5  ;;  %v135_v4 = vld [vmem:[#allocation2 + $0x128] sm:$0xff] }
  0xb4   :  { %810 = vmatprep.mubr.bf16.mxu0 %v1575_v6  ;;  %938 = vmatprep.mubr.bf16.mxu1 %v1577_v7 }
  0xbb   :  { %811 = vmatmul.mubr.bf16.gmra.mrb[52].mxu0 %v1579_v8  ;;  %939 = vmatmul.mubr.bf16.gmra.mrb[52].mxu1 %v1580_v9 }
  0xbc   :  { %818 = vmatprep.mubr.bf16.mxu0 %v1581_v10  ;;  %946 = vmatprep.mubr.bf16.mxu1 %v1583_v11 }
  0xc3   :  { %819 = vmatmul.mubr.bf16.gmra.mrb[56].mxu0 %v1585_v12  ;;  %947 = vmatmul.mubr.bf16.gmra.mrb[56].mxu1 %v1586_v13 }
  0xc4   :  { %826 = vmatprep.mubr.bf16.mxu0 %v1587_v14  ;;  %954 = vmatprep.mubr.bf16.mxu1 %v1589_v15 }
  0xcb   :  { %827 = vmatmul.mubr.bf16.gmra.mrb[60].mxu0 %v1591_v16  ;;  %955 = vmatmul.mubr.bf16.gmra.mrb[60].mxu1 %v1592_v17 }
 0x126   :  { %v708_v20 = vpop.f32.mrb[0].mxu0  ;;  %v836_v21 = vpop.f32.mrb[0].mxu1 }
 0x127   :  { %v963_v24 = vadd.f32 %v708_v20, %v98_v18  ;;  %v995_v25 = vadd.f32 %v836_v21, %v130_v19  ;;  %v710_v26 = vpop.f32.mrb[1].mxu0  ;;  %v838_v27 = vpop.f32.mrb[1].mxu1 }
 0x128   :  { %v711_v28 = vpop.f32.mrb[2].mxu0  ;;  %v839_v29 = vpop.f32.mrb[2].mxu1  ;;  %v136_v26 = vld [vmem:[#allocation2 + $0x130] sm:$0xff] }
 0x129   :  { %1028 = vst.msk [vmem:[#allocation2] sm:$0xff] %vm33_vm0, %v963_v24  ;;  %1060 = vst.msk [vmem:[#allocation2 + $0x100] sm:$0xff] %vm33_vm0, %v995_v25  ;;  %v964_v30 = vadd.f32 %v711_v28, %v99_v22  ;;  %v996_v31 = vadd.f32 %v839_v29, %v131_v23  ;;  %v713_v32 = vpop.f32.mrb[3].mxu0  ;;  %v841_v33 = vpop.f32.mrb[3].mxu1  ;;  %v104_v25 = vld [vmem:[#allocation2 + $0x30] sm:$0xff] }
 0x12a   :  { %v137_v32 = vld [vmem:[#allocation2 + $0x138] sm:$0xff] }
 0x12b   :  { %1029 = vst.msk [vmem:[#allocation2 + $0x8] sm:$0xff] %vm33_vm0, %v964_v30  ;;  %1061 = vst.msk [vmem:[#allocation2 + $0x108] sm:$0xff] %vm33_vm0, %v996_v31  ;;  %v105_v31 = vld [vmem:[#allocation2 + $0x38] sm:$0xff] }
 0x12e   :  { %v716_v37 = vpop.f32.mrb[4].mxu0  ;;  %v844_v38 = vpop.f32.mrb[4].mxu1 }
 0x12f   :  { %v965_v41 = vadd.f32 %v716_v37, %v100_v34  ;;  %v997_v42 = vadd.f32 %v844_v38, %v132_v35  ;;  %v718_v43 = vpop.f32.mrb[5].mxu0  ;;  %v846_v44 = vpop.f32.mrb[5].mxu1 }
 0x130   :  { %v1095_v45 = vld [vmem:[#allocation2] sm:$0xff]  ;;  %v719_v47 = vpop.f32.mrb[6].mxu0  ;;  %v847_v48 = vpop.f32.mrb[6].mxu1 }
 0x131   :  { %v1127_v46 = vld [vmem:[#allocation2 + $0x100] sm:$0xff]  ;;  %v1166_v49 = vadd.f32 %v1874_v36, %v1095_v45  ;;  %1030 = vst.msk [vmem:[#allocation2 + $0x10] sm:$0xff] %vm33_vm0, %v965_v41  ;;  %1062 = vst.msk [vmem:[#allocation2 + $0x110] sm:$0xff] %vm33_vm0, %v997_v42  ;;  %v966_v51 = vadd.f32 %v719_v47, %v101_v39  ;;  %v998_v52 = vadd.f32 %v847_v48, %v133_v40  ;;  %v721_v53 = vpop.f32.mrb[7].mxu0  ;;  %v849_v54 = vpop.f32.mrb[7].mxu1 }
 0x132   :  { %v1198_v50 = vadd.f32 %v1874_v36, %v1127_v46  ;;  %v1096_v55 = vld [vmem:[#allocation2 + $0x8] sm:$0xff]  ;;  %v106_v54 = vld [vmem:[#allocation2 + $0x40] sm:$0xff] }
 0x133   :  { %v1128_v56 = vld [vmem:[#allocation2 + $0x108] sm:$0xff]  ;;  %v1230_v57 = vmax.f32 %v1166_v49, 0.0  ;;  %v1167_v59 = vadd.f32 %v1874_v36, %v1096_v55  ;;  %1031 = vst.msk [vmem:[#allocation2 + $0x18] sm:$0xff] %vm33_vm0, %v966_v51  ;;  %1063 = vst.msk [vmem:[#allocation2 + $0x118] sm:$0xff] %vm33_vm0, %v998_v52  ;;  %v138_v55 = vld [vmem:[#allocation2 + $0x140] sm:$0xff] }
 0x134   :  { %v1262_v58 = vmax.f32 %v1198_v50, 0.0  ;;  %v1199_v60 = vadd.f32 %v1874_v36, %v1128_v56 }
 0x135   :  { %1294 = vst.msk [vmem:[%s2254_s3] sm:$0xff] %vm33_vm0, %v1230_v57  ;;  %v1231_v63 = vmax.f32 %v1167_v59, 0.0 }
 0x136   :  { %1326 = vst.msk [vmem:[%s2254_s3 + $0x100] sm:$0xff] %vm33_vm0, %v1262_v58  ;;  %v1263_v0 = vmax.f32 %v1199_v60, 0.0  ;;  %v724_v1 = vpop.f32.mrb[8].mxu0  ;;  %v852_v2 = vpop.f32.mrb[8].mxu1  ;;  %v107_v60 = vld [vmem:[#allocation2 + $0x48] sm:$0xff] }
 0x137   :  { %1295 = vst.msk [vmem:[%s2254_s3 + $0x8] sm:$0xff] %vm33_vm0, %v1231_v63  ;;  %v967_v5 = vadd.f32 %v724_v1, %v102_v61  ;;  %v999_v6 = vadd.f32 %v852_v2, %v134_v62  ;;  %v726_v7 = vpop.f32.mrb[9].mxu0  ;;  %v854_v8 = vpop.f32.mrb[9].mxu1  ;;  %v139_v61 = vld [vmem:[#allocation2 + $0x148] sm:$0xff] }
 0x138   :  { %1327 = vst.msk [vmem:[%s2254_s3 + $0x108] sm:$0xff] %vm33_vm0, %v1263_v0  ;;  %v1097_v9 = vld [vmem:[#allocation2 + $0x10] sm:$0xff]  ;;  %v727_v11 = vpop.f32.mrb[10].mxu0  ;;  %v855_v12 = vpop.f32.mrb[10].mxu1 }
 0x139   :  { %v1129_v10 = vld [vmem:[#allocation2 + $0x110] sm:$0xff]  ;;  %v1168_v13 = vadd.f32 %v1874_v36, %v1097_v9  ;;  %1032 = vst.msk [vmem:[#allocation2 + $0x20] sm:$0xff] %vm33_vm0, %v967_v5  ;;  %1064 = vst.msk [vmem:[#allocation2 + $0x120] sm:$0xff] %vm33_vm0, %v999_v6  ;;  %v968_v15 = vadd.f32 %v727_v11, %v103_v3  ;;  %v1000_v16 = vadd.f32 %v855_v12, %v135_v4  ;;  %v729_v17 = vpop.f32.mrb[11].mxu0  ;;  %v857_v18 = vpop.f32.mrb[11].mxu1 }
 0x13a   :  { %v1200_v14 = vadd.f32 %v1874_v36, %v1129_v10  ;;  %v1098_v19 = vld [vmem:[#allocation2 + $0x18] sm:$0xff]  ;;  %v108_v18 = vld [vmem:[#allocation2 + $0x50] sm:$0xff] }
 0x13b   :  { %v1130_v20 = vld [vmem:[#allocation2 + $0x118] sm:$0xff]  ;;  %v1232_v21 = vmax.f32 %v1168_v13, 0.0  ;;  %v1169_v23 = vadd.f32 %v1874_v36, %v1098_v19  ;;  %1033 = vst.msk [vmem:[#allocation2 + $0x28] sm:$0xff] %vm33_vm0, %v968_v15  ;;  %1065 = vst.msk [vmem:[#allocation2 + $0x128] sm:$0xff] %vm33_vm0, %v1000_v16  ;;  %v140_v19 = vld [vmem:[#allocation2 + $0x150] sm:$0xff] }
 0x13c   :  { %v1264_v22 = vmax.f32 %v1200_v14, 0.0  ;;  %v1201_v24 = vadd.f32 %v1874_v36, %v1130_v20 }
 0x13d   :  { %1296 = vst.msk [vmem:[%s2254_s3 + $0x10] sm:$0xff] %vm33_vm0, %v1232_v21  ;;  %v1233_v27 = vmax.f32 %v1169_v23, 0.0 }
 0x13e   :  { %1328 = vst.msk [vmem:[%s2254_s3 + $0x110] sm:$0xff] %vm33_vm0, %v1264_v22  ;;  %v1265_v28 = vmax.f32 %v1201_v24, 0.0  ;;  %v732_v29 = vpop.f32.mrb[12].mxu0  ;;  %v860_v30 = vpop.f32.mrb[12].mxu1  ;;  %v109_v24 = vld [vmem:[#allocation2 + $0x58] sm:$0xff] }
 0x13f   :  { %1297 = vst.msk [vmem:[%s2254_s3 + $0x18] sm:$0xff] %vm33_vm0, %v1233_v27  ;;  %v969_v33 = vadd.f32 %v732_v29, %v104_v25  ;;  %v1001_v34 = vadd.f32 %v860_v30, %v136_v26  ;;  %v734_v35 = vpop.f32.mrb[13].mxu0  ;;  %v862_v37 = vpop.f32.mrb[13].mxu1  ;;  %v141_v25 = vld [vmem:[#allocation2 + $0x158] sm:$0xff] }
 0x140   :  { %1329 = vst.msk [vmem:[%s2254_s3 + $0x118] sm:$0xff] %vm33_vm0, %v1265_v28  ;;  %v1099_v38 = vld [vmem:[#allocation2 + $0x20] sm:$0xff]  ;;  %v735_v40 = vpop.f32.mrb[14].mxu0  ;;  %v863_v41 = vpop.f32.mrb[14].mxu1 }
 0x141   :  { %v1131_v39 = vld [vmem:[#allocation2 + $0x120] sm:$0xff]  ;;  %v1170_v42 = vadd.f32 %v1874_v36, %v1099_v38  ;;  %1034 = vst.msk [vmem:[#allocation2 + $0x30] sm:$0xff] %vm33_vm0, %v969_v33  ;;  %1066 = vst.msk [vmem:[#allocation2 + $0x130] sm:$0xff] %vm33_vm0, %v1001_v34  ;;  %v970_v44 = vadd.f32 %v735_v40, %v105_v31  ;;  %v1002_v45 = vadd.f32 %v863_v41, %v137_v32  ;;  %v737_v46 = vpop.f32.mrb[15].mxu0  ;;  %v865_v47 = vpop.f32.mrb[15].mxu1 }
 0x142   :  { %v1202_v43 = vadd.f32 %v1874_v36, %v1131_v39  ;;  %v1100_v48 = vld [vmem:[#allocation2 + $0x28] sm:$0xff]  ;;  %v110_v47 = vld [vmem:[#allocation2 + $0x60] sm:$0xff] }
 0x143   :  { %v1132_v49 = vld [vmem:[#allocation2 + $0x128] sm:$0xff]  ;;  %v1234_v50 = vmax.f32 %v1170_v42, 0.0  ;;  %v1171_v52 = vadd.f32 %v1874_v36, %v1100_v48  ;;  %1035 = vst.msk [vmem:[#allocation2 + $0x38] sm:$0xff] %vm33_vm0, %v970_v44  ;;  %1067 = vst.msk [vmem:[#allocation2 + $0x138] sm:$0xff] %vm33_vm0, %v1002_v45  ;;  %v142_v48 = vld [vmem:[#allocation2 + $0x160] sm:$0xff] }
 0x144   :  { %v1266_v51 = vmax.f32 %v1202_v43, 0.0  ;;  %v1203_v53 = vadd.f32 %v1874_v36, %v1132_v49 }
 0x145   :  { %1298 = vst.msk [vmem:[%s2254_s3 + $0x20] sm:$0xff] %vm33_vm0, %v1234_v50  ;;  %v1235_v56 = vmax.f32 %v1171_v52, 0.0 }
 0x146   :  { %1330 = vst.msk [vmem:[%s2254_s3 + $0x120] sm:$0xff] %vm33_vm0, %v1266_v51  ;;  %v1267_v57 = vmax.f32 %v1203_v53, 0.0  ;;  %v740_v58 = vpop.f32.mrb[16].mxu0  ;;  %v868_v59 = vpop.f32.mrb[16].mxu1  ;;  %v111_v53 = vld [vmem:[#allocation2 + $0x68] sm:$0xff] }
 0x147   :  { %1299 = vst.msk [vmem:[%s2254_s3 + $0x28] sm:$0xff] %vm33_vm0, %v1235_v56  ;;  %v971_v62 = vadd.f32 %v740_v58, %v106_v54  ;;  %v1003_v63 = vadd.f32 %v868_v59, %v138_v55  ;;  %v742_v0 = vpop.f32.mrb[17].mxu0  ;;  %v870_v1 = vpop.f32.mrb[17].mxu1  ;;  %v143_v54 = vld [vmem:[#allocation2 + $0x168] sm:$0xff] }
 0x148   :  { %1331 = vst.msk [vmem:[%s2254_s3 + $0x128] sm:$0xff] %vm33_vm0, %v1267_v57  ;;  %v1101_v2 = vld [vmem:[#allocation2 + $0x30] sm:$0xff]  ;;  %v743_v4 = vpop.f32.mrb[18].mxu0  ;;  %v871_v5 = vpop.f32.mrb[18].mxu1 }
 0x149   :  { %v1133_v3 = vld [vmem:[#allocation2 + $0x130] sm:$0xff]  ;;  %v1172_v6 = vadd.f32 %v1874_v36, %v1101_v2  ;;  %1036 = vst.msk [vmem:[#allocation2 + $0x40] sm:$0xff] %vm33_vm0, %v971_v62  ;;  %1068 = vst.msk [vmem:[#allocation2 + $0x140] sm:$0xff] %vm33_vm0, %v1003_v63  ;;  %v972_v8 = vadd.f32 %v743_v4, %v107_v60  ;;  %v1004_v9 = vadd.f32 %v871_v5, %v139_v61  ;;  %v745_v10 = vpop.f32.mrb[19].mxu0  ;;  %v873_v11 = vpop.f32.mrb[19].mxu1 }
 0x14a   :  { %v1204_v7 = vadd.f32 %v1874_v36, %v1133_v3  ;;  %v1102_v12 = vld [vmem:[#allocation2 + $0x38] sm:$0xff]  ;;  %v112_v11 = vld [vmem:[#allocation2 + $0x70] sm:$0xff] }
 0x14b   :  { %v1134_v13 = vld [vmem:[#allocation2 + $0x138] sm:$0xff]  ;;  %v1236_v14 = vmax.f32 %v1172_v6, 0.0  ;;  %v1173_v16 = vadd.f32 %v1874_v36, %v1102_v12  ;;  %1037 = vst.msk [vmem:[#allocation2 + $0x48] sm:$0xff] %vm33_vm0, %v972_v8  ;;  %1069 = vst.msk [vmem:[#allocation2 + $0x148] sm:$0xff] %vm33_vm0, %v1004_v9  ;;  %v144_v12 = vld [vmem:[#allocation2 + $0x170] sm:$0xff] }
 0x14c   :  { %v1268_v15 = vmax.f32 %v1204_v7, 0.0  ;;  %v1205_v17 = vadd.f32 %v1874_v36, %v1134_v13 }
 0x14d   :  { %1300 = vst.msk [vmem:[%s2254_s3 + $0x30] sm:$0xff] %vm33_vm0, %v1236_v14  ;;  %v1237_v20 = vmax.f32 %v1173_v16, 0.0 }
 0x14e   :  { %1332 = vst.msk [vmem:[%s2254_s3 + $0x130] sm:$0xff] %vm33_vm0, %v1268_v15  ;;  %v1269_v21 = vmax.f32 %v1205_v17, 0.0  ;;  %v748_v22 = vpop.f32.mrb[20].mxu0  ;;  %v876_v23 = vpop.f32.mrb[20].mxu1  ;;  %v113_v17 = vld [vmem:[#allocation2 + $0x78] sm:$0xff] }
 0x14f   :  { %1301 = vst.msk [vmem:[%s2254_s3 + $0x38] sm:$0xff] %vm33_vm0, %v1237_v20  ;;  %v973_v26 = vadd.f32 %v748_v22, %v108_v18  ;;  %v1005_v27 = vadd.f32 %v876_v23, %v140_v19  ;;  %v750_v28 = vpop.f32.mrb[21].mxu0  ;;  %v878_v29 = vpop.f32.mrb[21].mxu1  ;;  %v145_v18 = vld [vmem:[#allocation2 + $0x178] sm:$0xff] }
 0x150   :  { %1333 = vst.msk [vmem:[%s2254_s3 + $0x138] sm:$0xff] %vm33_vm0, %v1269_v21  ;;  %v1103_v30 = vld [vmem:[#allocation2 + $0x40] sm:$0xff]  ;;  %v751_v32 = vpop.f32.mrb[22].mxu0  ;;  %v879_v33 = vpop.f32.mrb[22].mxu1 }
 0x151   :  { %v1135_v31 = vld [vmem:[#allocation2 + $0x140] sm:$0xff]  ;;  %v1174_v34 = vadd.f32 %v1874_v36, %v1103_v30  ;;  %1038 = vst.msk [vmem:[#allocation2 + $0x50] sm:$0xff] %vm33_vm0, %v973_v26  ;;  %1070 = vst.msk [vmem:[#allocation2 + $0x150] sm:$0xff] %vm33_vm0, %v1005_v27  ;;  %v974_v37 = vadd.f32 %v751_v32, %v109_v24  ;;  %v1006_v38 = vadd.f32 %v879_v33, %v141_v25  ;;  %v753_v39 = vpop.f32.mrb[23].mxu0  ;;  %v881_v40 = vpop.f32.mrb[23].mxu1 }
 0x152   :  { %v1206_v35 = vadd.f32 %v1874_v36, %v1135_v31  ;;  %v1104_v41 = vld [vmem:[#allocation2 + $0x48] sm:$0xff]  ;;  %v114_v40 = vld [vmem:[#allocation2 + $0x80] sm:$0xff] }
 0x153   :  { %v1136_v42 = vld [vmem:[#allocation2 + $0x148] sm:$0xff]  ;;  %v1238_v43 = vmax.f32 %v1174_v34, 0.0  ;;  %v1175_v45 = vadd.f32 %v1874_v36, %v1104_v41  ;;  %1039 = vst.msk [vmem:[#allocation2 + $0x58] sm:$0xff] %vm33_vm0, %v974_v37  ;;  %1071 = vst.msk [vmem:[#allocation2 + $0x158] sm:$0xff] %vm33_vm0, %v1006_v38  ;;  %v146_v41 = vld [vmem:[#allocation2 + $0x180] sm:$0xff] }
 0x154   :  { %v1270_v44 = vmax.f32 %v1206_v35, 0.0  ;;  %v1207_v46 = vadd.f32 %v1874_v36, %v1136_v42 }
 0x155   :  { %1302 = vst.msk [vmem:[%s2254_s3 + $0x40] sm:$0xff] %vm33_vm0, %v1238_v43  ;;  %v1239_v49 = vmax.f32 %v1175_v45, 0.0 }
 0x156   :  { %1334 = vst.msk [vmem:[%s2254_s3 + $0x140] sm:$0xff] %vm33_vm0, %v1270_v44  ;;  %v1271_v50 = vmax.f32 %v1207_v46, 0.0  ;;  %v756_v51 = vpop.f32.mrb[24].mxu0  ;;  %v884_v52 = vpop.f32.mrb[24].mxu1  ;;  %v115_v46 = vld [vmem:[#allocation2 + $0x88] sm:$0xff] }
 0x157   :  { %1303 = vst.msk [vmem:[%s2254_s3 + $0x48] sm:$0xff] %vm33_vm0, %v1239_v49  ;;  %v975_v55 = vadd.f32 %v756_v51, %v110_v47  ;;  %v1007_v56 = vadd.f32 %v884_v52, %v142_v48  ;;  %v758_v57 = vpop.f32.mrb[25].mxu0  ;;  %v886_v58 = vpop.f32.mrb[25].mxu1  ;;  %v147_v47 = vld [vmem:[#allocation2 + $0x188] sm:$0xff] }
 0x158   :  { %1335 = vst.msk [vmem:[%s2254_s3 + $0x148] sm:$0xff] %vm33_vm0, %v1271_v50  ;;  %v1105_v59 = vld [vmem:[#allocation2 + $0x50] sm:$0xff]  ;;  %v759_v61 = vpop.f32.mrb[26].mxu0  ;;  %v887_v62 = vpop.f32.mrb[26].mxu1 }
 0x159   :  { %v1137_v60 = vld [vmem:[#allocation2 + $0x150] sm:$0xff]  ;;  %v1176_v63 = vadd.f32 %v1874_v36, %v1105_v59  ;;  %1040 = vst.msk [vmem:[#allocation2 + $0x60] sm:$0xff] %vm33_vm0, %v975_v55  ;;  %1072 = vst.msk [vmem:[#allocation2 + $0x160] sm:$0xff] %vm33_vm0, %v1007_v56  ;;  %v976_v1 = vadd.f32 %v759_v61, %v111_v53  ;;  %v1008_v2 = vadd.f32 %v887_v62, %v143_v54  ;;  %v761_v3 = vpop.f32.mrb[27].mxu0  ;;  %v889_v4 = vpop.f32.mrb[27].mxu1 }
 0x15a   :  { %v1208_v0 = vadd.f32 %v1874_v36, %v1137_v60  ;;  %v1106_v5 = vld [vmem:[#allocation2 + $0x58] sm:$0xff]  ;;  %v116_v4 = vld [vmem:[#allocation2 + $0x90] sm:$0xff] }
 0x15b   :  { %v1138_v6 = vld [vmem:[#allocation2 + $0x158] sm:$0xff]  ;;  %v1240_v7 = vmax.f32 %v1176_v63, 0.0  ;;  %v1177_v9 = vadd.f32 %v1874_v36, %v1106_v5  ;;  %1041 = vst.msk [vmem:[#allocation2 + $0x68] sm:$0xff] %vm33_vm0, %v976_v1  ;;  %1073 = vst.msk [vmem:[#allocation2 + $0x168] sm:$0xff] %vm33_vm0, %v1008_v2  ;;  %v148_v5 = vld [vmem:[#allocation2 + $0x190] sm:$0xff] }
 0x15c   :  { %v1272_v8 = vmax.f32 %v1208_v0, 0.0  ;;  %v1209_v10 = vadd.f32 %v1874_v36, %v1138_v6 }
 0x15d   :  { %1304 = vst.msk [vmem:[%s2254_s3 + $0x50] sm:$0xff] %vm33_vm0, %v1240_v7  ;;  %v1241_v13 = vmax.f32 %v1177_v9, 0.0 }
 0x15e   :  { %1336 = vst.msk [vmem:[%s2254_s3 + $0x150] sm:$0xff] %vm33_vm0, %v1272_v8  ;;  %v1273_v14 = vmax.f32 %v1209_v10, 0.0  ;;  %v764_v15 = vpop.f32.mrb[28].mxu0  ;;  %v892_v16 = vpop.f32.mrb[28].mxu1  ;;  %v117_v10 = vld [vmem:[#allocation2 + $0x98] sm:$0xff] }
 0x15f   :  { %1305 = vst.msk [vmem:[%s2254_s3 + $0x58] sm:$0xff] %vm33_vm0, %v1241_v13  ;;  %v977_v19 = vadd.f32 %v764_v15, %v112_v11  ;;  %v1009_v20 = vadd.f32 %v892_v16, %v144_v12  ;;  %v766_v21 = vpop.f32.mrb[29].mxu0  ;;  %v894_v22 = vpop.f32.mrb[29].mxu1  ;;  %v149_v11 = vld [vmem:[#allocation2 + $0x198] sm:$0xff] }
 0x160   :  { %1337 = vst.msk [vmem:[%s2254_s3 + $0x158] sm:$0xff] %vm33_vm0, %v1273_v14  ;;  %v1107_v23 = vld [vmem:[#allocation2 + $0x60] sm:$0xff]  ;;  %v767_v25 = vpop.f32.mrb[30].mxu0  ;;  %v895_v26 = vpop.f32.mrb[30].mxu1 }
 0x161   :  { %v1139_v24 = vld [vmem:[#allocation2 + $0x160] sm:$0xff]  ;;  %v1178_v27 = vadd.f32 %v1874_v36, %v1107_v23  ;;  %1042 = vst.msk [vmem:[#allocation2 + $0x70] sm:$0xff] %vm33_vm0, %v977_v19  ;;  %1074 = vst.msk [vmem:[#allocation2 + $0x170] sm:$0xff] %vm33_vm0, %v1009_v20  ;;  %v978_v29 = vadd.f32 %v767_v25, %v113_v17  ;;  %v1010_v30 = vadd.f32 %v895_v26, %v145_v18  ;;  %v769_v31 = vpop.f32.mrb[31].mxu0  ;;  %v897_v32 = vpop.f32.mrb[31].mxu1 }
 0x162   :  { %v1210_v28 = vadd.f32 %v1874_v36, %v1139_v24  ;;  %v1108_v33 = vld [vmem:[#allocation2 + $0x68] sm:$0xff]  ;;  %v118_v32 = vld [vmem:[#allocation2 + $0xa0] sm:$0xff] }
 0x163   :  { %v1140_v34 = vld [vmem:[#allocation2 + $0x168] sm:$0xff]  ;;  %v1242_v35 = vmax.f32 %v1178_v27, 0.0  ;;  %v1179_v38 = vadd.f32 %v1874_v36, %v1108_v33  ;;  %1043 = vst.msk [vmem:[#allocation2 + $0x78] sm:$0xff] %vm33_vm0, %v978_v29  ;;  %1075 = vst.msk [vmem:[#allocation2 + $0x178] sm:$0xff] %vm33_vm0, %v1010_v30  ;;  %v150_v33 = vld [vmem:[#allocation2 + $0x1a0] sm:$0xff] }
 0x164   :  { %v1274_v37 = vmax.f32 %v1210_v28, 0.0  ;;  %v1211_v39 = vadd.f32 %v1874_v36, %v1140_v34 }
 0x165   :  { %1306 = vst.msk [vmem:[%s2254_s3 + $0x60] sm:$0xff] %vm33_vm0, %v1242_v35  ;;  %v1243_v42 = vmax.f32 %v1179_v38, 0.0 }
 0x166   :  { %1338 = vst.msk [vmem:[%s2254_s3 + $0x160] sm:$0xff] %vm33_vm0, %v1274_v37  ;;  %v1275_v43 = vmax.f32 %v1211_v39, 0.0  ;;  %v772_v44 = vpop.f32.mrb[32].mxu0  ;;  %v900_v45 = vpop.f32.mrb[32].mxu1  ;;  %v119_v39 = vld [vmem:[#allocation2 + $0xa8] sm:$0xff] }
 0x167   :  { %1307 = vst.msk [vmem:[%s2254_s3 + $0x68] sm:$0xff] %vm33_vm0, %v1243_v42  ;;  %v979_v48 = vadd.f32 %v772_v44, %v114_v40  ;;  %v1011_v49 = vadd.f32 %v900_v45, %v146_v41  ;;  %v774_v50 = vpop.f32.mrb[33].mxu0  ;;  %v902_v51 = vpop.f32.mrb[33].mxu1  ;;  %v151_v40 = vld [vmem:[#allocation2 + $0x1a8] sm:$0xff] }
 0x168   :  { %1339 = vst.msk [vmem:[%s2254_s3 + $0x168] sm:$0xff] %vm33_vm0, %v1275_v43  ;;  %v1109_v52 = vld [vmem:[#allocation2 + $0x70] sm:$0xff]  ;;  %v775_v54 = vpop.f32.mrb[34].mxu0  ;;  %v903_v55 = vpop.f32.mrb[34].mxu1 }
 0x169   :  { %v1141_v53 = vld [vmem:[#allocation2 + $0x170] sm:$0xff]  ;;  %v1180_v56 = vadd.f32 %v1874_v36, %v1109_v52  ;;  %1044 = vst.msk [vmem:[#allocation2 + $0x80] sm:$0xff] %vm33_vm0, %v979_v48  ;;  %1076 = vst.msk [vmem:[#allocation2 + $0x180] sm:$0xff] %vm33_vm0, %v1011_v49  ;;  %v980_v58 = vadd.f32 %v775_v54, %v115_v46  ;;  %v1012_v59 = vadd.f32 %v903_v55, %v147_v47  ;;  %v777_v60 = vpop.f32.mrb[35].mxu0  ;;  %v905_v61 = vpop.f32.mrb[35].mxu1 }
 0x16a   :  { %v1212_v57 = vadd.f32 %v1874_v36, %v1141_v53  ;;  %v1110_v62 = vld [vmem:[#allocation2 + $0x78] sm:$0xff]  ;;  %v120_v61 = vld [vmem:[#allocation2 + $0xb0] sm:$0xff] }
 0x16b   :  { %v1142_v63 = vld [vmem:[#allocation2 + $0x178] sm:$0xff]  ;;  %v1244_v0 = vmax.f32 %v1180_v56, 0.0  ;;  %v1181_v2 = vadd.f32 %v1874_v36, %v1110_v62  ;;  %1045 = vst.msk [vmem:[#allocation2 + $0x88] sm:$0xff] %vm33_vm0, %v980_v58  ;;  %1077 = vst.msk [vmem:[#allocation2 + $0x188] sm:$0xff] %vm33_vm0, %v1012_v59  ;;  %v152_v62 = vld [vmem:[#allocation2 + $0x1b0] sm:$0xff] }
 0x16c   :  { %v1276_v1 = vmax.f32 %v1212_v57, 0.0  ;;  %v1213_v3 = vadd.f32 %v1874_v36, %v1142_v63 }
 0x16d   :  { %1308 = vst.msk [vmem:[%s2254_s3 + $0x70] sm:$0xff] %vm33_vm0, %v1244_v0  ;;  %v1245_v6 = vmax.f32 %v1181_v2, 0.0 }
 0x16e   :  { %1340 = vst.msk [vmem:[%s2254_s3 + $0x170] sm:$0xff] %vm33_vm0, %v1276_v1  ;;  %v1277_v7 = vmax.f32 %v1213_v3, 0.0  ;;  %v780_v8 = vpop.f32.mrb[36].mxu0  ;;  %v908_v9 = vpop.f32.mrb[36].mxu1  ;;  %v121_v3 = vld [vmem:[#allocation2 + $0xb8] sm:$0xff] }
 0x16f   :  { %1309 = vst.msk [vmem:[%s2254_s3 + $0x78] sm:$0xff] %vm33_vm0, %v1245_v6  ;;  %v981_v12 = vadd.f32 %v780_v8, %v116_v4  ;;  %v1013_v13 = vadd.f32 %v908_v9, %v148_v5  ;;  %v782_v14 = vpop.f32.mrb[37].mxu0  ;;  %v910_v15 = vpop.f32.mrb[37].mxu1  ;;  %v153_v4 = vld [vmem:[#allocation2 + $0x1b8] sm:$0xff] }
 0x170   :  { %1341 = vst.msk [vmem:[%s2254_s3 + $0x178] sm:$0xff] %vm33_vm0, %v1277_v7  ;;  %v1111_v16 = vld [vmem:[#allocation2 + $0x80] sm:$0xff]  ;;  %v783_v18 = vpop.f32.mrb[38].mxu0  ;;  %v911_v19 = vpop.f32.mrb[38].mxu1 }
 0x171   :  { %v1143_v17 = vld [vmem:[#allocation2 + $0x180] sm:$0xff]  ;;  %v1182_v20 = vadd.f32 %v1874_v36, %v1111_v16  ;;  %1046 = vst.msk [vmem:[#allocation2 + $0x90] sm:$0xff] %vm33_vm0, %v981_v12  ;;  %1078 = vst.msk [vmem:[#allocation2 + $0x190] sm:$0xff] %vm33_vm0, %v1013_v13  ;;  %v982_v22 = vadd.f32 %v783_v18, %v117_v10  ;;  %v1014_v23 = vadd.f32 %v911_v19, %v149_v11  ;;  %v785_v24 = vpop.f32.mrb[39].mxu0  ;;  %v913_v25 = vpop.f32.mrb[39].mxu1 }
 0x172   :  { %v1214_v21 = vadd.f32 %v1874_v36, %v1143_v17  ;;  %v1112_v26 = vld [vmem:[#allocation2 + $0x88] sm:$0xff]  ;;  %v122_v25 = vld [vmem:[#allocation2 + $0xc0] sm:$0xff] }
 0x173   :  { %v1144_v27 = vld [vmem:[#allocation2 + $0x188] sm:$0xff]  ;;  %v1246_v28 = vmax.f32 %v1182_v20, 0.0  ;;  %v1183_v30 = vadd.f32 %v1874_v36, %v1112_v26  ;;  %1047 = vst.msk [vmem:[#allocation2 + $0x98] sm:$0xff] %vm33_vm0, %v982_v22  ;;  %1079 = vst.msk [vmem:[#allocation2 + $0x198] sm:$0xff] %vm33_vm0, %v1014_v23  ;;  %v154_v26 = vld [vmem:[#allocation2 + $0x1c0] sm:$0xff] }
 0x174   :  { %v1278_v29 = vmax.f32 %v1214_v21, 0.0  ;;  %v1215_v31 = vadd.f32 %v1874_v36, %v1144_v27 }
 0x175   :  { %1310 = vst.msk [vmem:[%s2254_s3 + $0x80] sm:$0xff] %vm33_vm0, %v1246_v28  ;;  %v1247_v34 = vmax.f32 %v1183_v30, 0.0 }
 0x176   :  { %1342 = vst.msk [vmem:[%s2254_s3 + $0x180] sm:$0xff] %vm33_vm0, %v1278_v29  ;;  %v1279_v35 = vmax.f32 %v1215_v31, 0.0  ;;  %v788_v37 = vpop.f32.mrb[40].mxu0  ;;  %v916_v38 = vpop.f32.mrb[40].mxu1  ;;  %v123_v31 = vld [vmem:[#allocation2 + $0xc8] sm:$0xff] }
 0x177   :  { %1311 = vst.msk [vmem:[%s2254_s3 + $0x88] sm:$0xff] %vm33_vm0, %v1247_v34  ;;  %v983_v41 = vadd.f32 %v788_v37, %v118_v32  ;;  %v1015_v42 = vadd.f32 %v916_v38, %v150_v33  ;;  %v790_v43 = vpop.f32.mrb[41].mxu0  ;;  %v918_v44 = vpop.f32.mrb[41].mxu1  ;;  %v155_v32 = vld [vmem:[#allocation2 + $0x1c8] sm:$0xff] }
 0x178   :  { %1343 = vst.msk [vmem:[%s2254_s3 + $0x188] sm:$0xff] %vm33_vm0, %v1279_v35  ;;  %v1113_v45 = vld [vmem:[#allocation2 + $0x90] sm:$0xff]  ;;  %v791_v47 = vpop.f32.mrb[42].mxu0  ;;  %v919_v48 = vpop.f32.mrb[42].mxu1 }
 0x179   :  { %v1145_v46 = vld [vmem:[#allocation2 + $0x190] sm:$0xff]  ;;  %v1184_v49 = vadd.f32 %v1874_v36, %v1113_v45  ;;  %1048 = vst.msk [vmem:[#allocation2 + $0xa0] sm:$0xff] %vm33_vm0, %v983_v41  ;;  %1080 = vst.msk [vmem:[#allocation2 + $0x1a0] sm:$0xff] %vm33_vm0, %v1015_v42  ;;  %v984_v51 = vadd.f32 %v791_v47, %v119_v39  ;;  %v1016_v52 = vadd.f32 %v919_v48, %v151_v40  ;;  %v793_v53 = vpop.f32.mrb[43].mxu0  ;;  %v921_v54 = vpop.f32.mrb[43].mxu1 }
 0x17a   :  { %v1216_v50 = vadd.f32 %v1874_v36, %v1145_v46  ;;  %v1114_v55 = vld [vmem:[#allocation2 + $0x98] sm:$0xff]  ;;  %v124_v54 = vld [vmem:[#allocation2 + $0xd0] sm:$0xff] }
 0x17b   :  { %v1146_v56 = vld [vmem:[#allocation2 + $0x198] sm:$0xff]  ;;  %v1248_v57 = vmax.f32 %v1184_v49, 0.0  ;;  %v1185_v59 = vadd.f32 %v1874_v36, %v1114_v55  ;;  %1049 = vst.msk [vmem:[#allocation2 + $0xa8] sm:$0xff] %vm33_vm0, %v984_v51  ;;  %1081 = vst.msk [vmem:[#allocation2 + $0x1a8] sm:$0xff] %vm33_vm0, %v1016_v52  ;;  %v156_v55 = vld [vmem:[#allocation2 + $0x1d0] sm:$0xff] }
 0x17c   :  { %v1280_v58 = vmax.f32 %v1216_v50, 0.0  ;;  %v1217_v60 = vadd.f32 %v1874_v36, %v1146_v56 }
 0x17d   :  { %1312 = vst.msk [vmem:[%s2254_s3 + $0x90] sm:$0xff] %vm33_vm0, %v1248_v57  ;;  %v1249_v63 = vmax.f32 %v1185_v59, 0.0 }
 0x17e   :  { %1344 = vst.msk [vmem:[%s2254_s3 + $0x190] sm:$0xff] %vm33_vm0, %v1280_v58  ;;  %v1281_v0 = vmax.f32 %v1217_v60, 0.0  ;;  %v796_v1 = vpop.f32.mrb[44].mxu0  ;;  %v924_v2 = vpop.f32.mrb[44].mxu1  ;;  %v125_v60 = vld [vmem:[#allocation2 + $0xd8] sm:$0xff] }
 0x17f   :  { %1313 = vst.msk [vmem:[%s2254_s3 + $0x98] sm:$0xff] %vm33_vm0, %v1249_v63  ;;  %v985_v5 = vadd.f32 %v796_v1, %v120_v61  ;;  %v1017_v6 = vadd.f32 %v924_v2, %v152_v62  ;;  %v798_v7 = vpop.f32.mrb[45].mxu0  ;;  %v926_v8 = vpop.f32.mrb[45].mxu1  ;;  %v157_v61 = vld [vmem:[#allocation2 + $0x1d8] sm:$0xff] }
 0x180   :  { %1345 = vst.msk [vmem:[%s2254_s3 + $0x198] sm:$0xff] %vm33_vm0, %v1281_v0  ;;  %v1115_v9 = vld [vmem:[#allocation2 + $0xa0] sm:$0xff]  ;;  %v799_v11 = vpop.f32.mrb[46].mxu0  ;;  %v927_v12 = vpop.f32.mrb[46].mxu1 }
 0x181   :  { %v1147_v10 = vld [vmem:[#allocation2 + $0x1a0] sm:$0xff]  ;;  %v1186_v13 = vadd.f32 %v1874_v36, %v1115_v9  ;;  %1050 = vst.msk [vmem:[#allocation2 + $0xb0] sm:$0xff] %vm33_vm0, %v985_v5  ;;  %1082 = vst.msk [vmem:[#allocation2 + $0x1b0] sm:$0xff] %vm33_vm0, %v1017_v6  ;;  %v986_v15 = vadd.f32 %v799_v11, %v121_v3  ;;  %v1018_v16 = vadd.f32 %v927_v12, %v153_v4  ;;  %v801_v17 = vpop.f32.mrb[47].mxu0  ;;  %v929_v18 = vpop.f32.mrb[47].mxu1 }
 0x182   :  { %v1218_v14 = vadd.f32 %v1874_v36, %v1147_v10  ;;  %v1116_v19 = vld [vmem:[#allocation2 + $0xa8] sm:$0xff]  ;;  %v126_v18 = vld [vmem:[#allocation2 + $0xe0] sm:$0xff] }
 0x183   :  { %v1148_v20 = vld [vmem:[#allocation2 + $0x1a8] sm:$0xff]  ;;  %v1250_v21 = vmax.f32 %v1186_v13, 0.0  ;;  %v1187_v23 = vadd.f32 %v1874_v36, %v1116_v19  ;;  %1051 = vst.msk [vmem:[#allocation2 + $0xb8] sm:$0xff] %vm33_vm0, %v986_v15  ;;  %1083 = vst.msk [vmem:[#allocation2 + $0x1b8] sm:$0xff] %vm33_vm0, %v1018_v16  ;;  %v158_v19 = vld [vmem:[#allocation2 + $0x1e0] sm:$0xff] }
 0x184   :  { %v1282_v22 = vmax.f32 %v1218_v14, 0.0  ;;  %v1219_v24 = vadd.f32 %v1874_v36, %v1148_v20 }
 0x185   :  { %1314 = vst.msk [vmem:[%s2254_s3 + $0xa0] sm:$0xff] %vm33_vm0, %v1250_v21  ;;  %v1251_v27 = vmax.f32 %v1187_v23, 0.0 }
 0x186   :  { %1346 = vst.msk [vmem:[%s2254_s3 + $0x1a0] sm:$0xff] %vm33_vm0, %v1282_v22  ;;  %v1283_v28 = vmax.f32 %v1219_v24, 0.0  ;;  %v804_v29 = vpop.f32.mrb[48].mxu0  ;;  %v932_v30 = vpop.f32.mrb[48].mxu1  ;;  %v127_v24 = vld [vmem:[#allocation2 + $0xe8] sm:$0xff] }
 0x187   :  { %1315 = vst.msk [vmem:[%s2254_s3 + $0xa8] sm:$0xff] %vm33_vm0, %v1251_v27  ;;  %v987_v33 = vadd.f32 %v804_v29, %v122_v25  ;;  %v1019_v34 = vadd.f32 %v932_v30, %v154_v26  ;;  %v806_v35 = vpop.f32.mrb[49].mxu0  ;;  %v934_v37 = vpop.f32.mrb[49].mxu1  ;;  %v159_v25 = vld [vmem:[#allocation2 + $0x1e8] sm:$0xff] }
 0x188   :  { %1347 = vst.msk [vmem:[%s2254_s3 + $0x1a8] sm:$0xff] %vm33_vm0, %v1283_v28  ;;  %v1117_v38 = vld [vmem:[#allocation2 + $0xb0] sm:$0xff]  ;;  %v807_v40 = vpop.f32.mrb[50].mxu0  ;;  %v935_v41 = vpop.f32.mrb[50].mxu1 }
 0x189   :  { %v1149_v39 = vld [vmem:[#allocation2 + $0x1b0] sm:$0xff]  ;;  %v1188_v42 = vadd.f32 %v1874_v36, %v1117_v38  ;;  %1052 = vst.msk [vmem:[#allocation2 + $0xc0] sm:$0xff] %vm33_vm0, %v987_v33  ;;  %1084 = vst.msk [vmem:[#allocation2 + $0x1c0] sm:$0xff] %vm33_vm0, %v1019_v34  ;;  %v988_v44 = vadd.f32 %v807_v40, %v123_v31  ;;  %v1020_v45 = vadd.f32 %v935_v41, %v155_v32  ;;  %v809_v46 = vpop.f32.mrb[51].mxu0  ;;  %v937_v47 = vpop.f32.mrb[51].mxu1 }
 0x18a   :  { %v1220_v43 = vadd.f32 %v1874_v36, %v1149_v39  ;;  %v1118_v48 = vld [vmem:[#allocation2 + $0xb8] sm:$0xff]  ;;  %v128_v47 = vld [vmem:[#allocation2 + $0xf0] sm:$0xff] }
 0x18b   :  { %v1150_v49 = vld [vmem:[#allocation2 + $0x1b8] sm:$0xff]  ;;  %v1252_v50 = vmax.f32 %v1188_v42, 0.0  ;;  %v1189_v52 = vadd.f32 %v1874_v36, %v1118_v48  ;;  %1053 = vst.msk [vmem:[#allocation2 + $0xc8] sm:$0xff] %vm33_vm0, %v988_v44  ;;  %1085 = vst.msk [vmem:[#allocation2 + $0x1c8] sm:$0xff] %vm33_vm0, %v1020_v45  ;;  %v160_v48 = vld [vmem:[#allocation2 + $0x1f0] sm:$0xff] }
 0x18c   :  { %v1284_v51 = vmax.f32 %v1220_v43, 0.0  ;;  %v1221_v53 = vadd.f32 %v1874_v36, %v1150_v49 }
 0x18d   :  { %1316 = vst.msk [vmem:[%s2254_s3 + $0xb0] sm:$0xff] %vm33_vm0, %v1252_v50  ;;  %v1253_v56 = vmax.f32 %v1189_v52, 0.0  ;;  %v129_v52 = vld [vmem:[#allocation2 + $0xf8] sm:$0xff] }
 0x18e   :  { %1348 = vst.msk [vmem:[%s2254_s3 + $0x1b0] sm:$0xff] %vm33_vm0, %v1284_v51  ;;  %v1285_v57 = vmax.f32 %v1221_v53, 0.0  ;;  %v812_v58 = vpop.f32.mrb[52].mxu0  ;;  %v940_v59 = vpop.f32.mrb[52].mxu1  ;;  %v161_v53 = vld [vmem:[#allocation2 + $0x1f8] sm:$0xff] }
 0x18f   :  { %1317 = vst.msk [vmem:[%s2254_s3 + $0xb8] sm:$0xff] %vm33_vm0, %v1253_v56  ;;  %v989_v62 = vadd.f32 %v812_v58, %v124_v54  ;;  %v1021_v63 = vadd.f32 %v940_v59, %v156_v55  ;;  %v814_v0 = vpop.f32.mrb[53].mxu0  ;;  %v942_v1 = vpop.f32.mrb[53].mxu1 }
 0x190   :  { %1349 = vst.msk [vmem:[%s2254_s3 + $0x1b8] sm:$0xff] %vm33_vm0, %v1285_v57  ;;  %v1119_v2 = vld [vmem:[#allocation2 + $0xc0] sm:$0xff]  ;;  %v815_v4 = vpop.f32.mrb[54].mxu0  ;;  %v943_v5 = vpop.f32.mrb[54].mxu1 }
 0x191   :  { %v1151_v3 = vld [vmem:[#allocation2 + $0x1c0] sm:$0xff]  ;;  %v1190_v6 = vadd.f32 %v1874_v36, %v1119_v2  ;;  %1054 = vst.msk [vmem:[#allocation2 + $0xd0] sm:$0xff] %vm33_vm0, %v989_v62  ;;  %1086 = vst.msk [vmem:[#allocation2 + $0x1d0] sm:$0xff] %vm33_vm0, %v1021_v63  ;;  %v990_v8 = vadd.f32 %v815_v4, %v125_v60  ;;  %v1022_v9 = vadd.f32 %v943_v5, %v157_v61  ;;  %v817_v10 = vpop.f32.mrb[55].mxu0  ;;  %v945_v11 = vpop.f32.mrb[55].mxu1 }
 0x192   :  { %v1222_v7 = vadd.f32 %v1874_v36, %v1151_v3  ;;  %v1120_v12 = vld [vmem:[#allocation2 + $0xc8] sm:$0xff]  ;;  %v1593_v62 = vld [vmem:[%s2253_s2] ss:$0 sm:$0xff] }
 0x193   :  { %v1152_v13 = vld [vmem:[#allocation2 + $0x1c8] sm:$0xff]  ;;  %v1254_v14 = vmax.f32 %v1190_v6, 0.0  ;;  %v1191_v16 = vadd.f32 %v1874_v36, %v1120_v12  ;;  %1055 = vst.msk [vmem:[#allocation2 + $0xd8] sm:$0xff] %vm33_vm0, %v990_v8  ;;  %1087 = vst.msk [vmem:[#allocation2 + $0x1d8] sm:$0xff] %vm33_vm0, %v1022_v9 }
 0x194   :  { %v1286_v15 = vmax.f32 %v1222_v7, 0.0  ;;  %v1223_v17 = vadd.f32 %v1874_v36, %v1152_v13 }
 0x195   :  { %1318 = vst.msk [vmem:[%s2254_s3 + $0xc0] sm:$0xff] %vm33_vm0, %v1254_v14  ;;  %v1255_v20 = vmax.f32 %v1191_v16, 0.0 }
 0x196   :  { %1350 = vst.msk [vmem:[%s2254_s3 + $0x1c0] sm:$0xff] %vm33_vm0, %v1286_v15  ;;  %v1287_v21 = vmax.f32 %v1223_v17, 0.0  ;;  %v820_v22 = vpop.f32.mrb[56].mxu0  ;;  %v948_v23 = vpop.f32.mrb[56].mxu1 }
 0x197   :  { %1319 = vst.msk [vmem:[%s2254_s3 + $0xc8] sm:$0xff] %vm33_vm0, %v1255_v20  ;;  %v991_v26 = vadd.f32 %v820_v22, %v126_v18  ;;  %v1023_v27 = vadd.f32 %v948_v23, %v158_v19  ;;  %v822_v28 = vpop.f32.mrb[57].mxu0  ;;  %v950_v29 = vpop.f32.mrb[57].mxu1 }
 0x198   :  { %1351 = vst.msk [vmem:[%s2254_s3 + $0x1c8] sm:$0xff] %vm33_vm0, %v1287_v21  ;;  %v1121_v30 = vld [vmem:[#allocation2 + $0xd0] sm:$0xff]  ;;  %v823_v32 = vpop.f32.mrb[58].mxu0  ;;  %v951_v33 = vpop.f32.mrb[58].mxu1 }
 0x199   :  { %v1153_v31 = vld [vmem:[#allocation2 + $0x1d0] sm:$0xff]  ;;  %v1192_v34 = vadd.f32 %v1874_v36, %v1121_v30  ;;  %1056 = vst.msk [vmem:[#allocation2 + $0xe0] sm:$0xff] %vm33_vm0, %v991_v26  ;;  %1088 = vst.msk [vmem:[#allocation2 + $0x1e0] sm:$0xff] %vm33_vm0, %v1023_v27  ;;  %v992_v37 = vadd.f32 %v823_v32, %v127_v24  ;;  %v1024_v38 = vadd.f32 %v951_v33, %v159_v25  ;;  %v825_v39 = vpop.f32.mrb[59].mxu0  ;;  %v953_v40 = vpop.f32.mrb[59].mxu1 }
 0x19a   :  { %v1224_v35 = vadd.f32 %v1874_v36, %v1153_v31  ;;  %v1122_v41 = vld [vmem:[#allocation2 + $0xd8] sm:$0xff] }
 0x19b   :  { %v1154_v42 = vld [vmem:[#allocation2 + $0x1d8] sm:$0xff]  ;;  %v1256_v43 = vmax.f32 %v1192_v34, 0.0  ;;  %v1193_v45 = vadd.f32 %v1874_v36, %v1122_v41  ;;  %1057 = vst.msk [vmem:[#allocation2 + $0xe8] sm:$0xff] %vm33_vm0, %v992_v37  ;;  %1089 = vst.msk [vmem:[#allocation2 + $0x1e8] sm:$0xff] %vm33_vm0, %v1024_v38 }
 0x19c   :  { %v1288_v44 = vmax.f32 %v1224_v35, 0.0  ;;  %v1225_v46 = vadd.f32 %v1874_v36, %v1154_v42 }
 0x19d   :  { %1320 = vst.msk [vmem:[%s2254_s3 + $0xd0] sm:$0xff] %vm33_vm0, %v1256_v43  ;;  %v1257_v49 = vmax.f32 %v1193_v45, 0.0 }
 0x19e   :  { %1352 = vst.msk [vmem:[%s2254_s3 + $0x1d0] sm:$0xff] %vm33_vm0, %v1288_v44  ;;  %v1289_v50 = vmax.f32 %v1225_v46, 0.0  ;;  %v828_v51 = vpop.f32.mrb[60].mxu0  ;;  %v956_v36 = vpop.f32.mrb[60].mxu1 }
 0x19f   :  { %1321 = vst.msk [vmem:[%s2254_s3 + $0xd8] sm:$0xff] %vm33_vm0, %v1257_v49  ;;  %v993_v54 = vadd.f32 %v828_v51, %v128_v47  ;;  %v1025_v55 = vadd.f32 %v956_v36, %v160_v48  ;;  %v830_v56 = vpop.f32.mrb[61].mxu0  ;;  %v958_v57 = vpop.f32.mrb[61].mxu1 }
 0x1a0   :  { %1353 = vst.msk [vmem:[%s2254_s3 + $0x1d8] sm:$0xff] %vm33_vm0, %v1289_v50  ;;  %v1123_v58 = vld [vmem:[#allocation2 + $0xe0] sm:$0xff]  ;;  %v831_v60 = vpop.f32.mrb[62].mxu0  ;;  %v959_v61 = vpop.f32.mrb[62].mxu1 }
 0x1a1   :  { %v1155_v59 = vld [vmem:[#allocation2 + $0x1e0] sm:$0xff]  ;;  %v1194_v63 = vadd.f32 %v1593_v62, %v1123_v58  ;;  %1058 = vst.msk [vmem:[#allocation2 + $0xf0] sm:$0xff] %vm33_vm0, %v993_v54  ;;  %1090 = vst.msk [vmem:[#allocation2 + $0x1f0] sm:$0xff] %vm33_vm0, %v1025_v55  ;;  %v994_v1 = vadd.f32 %v831_v60, %v129_v52  ;;  %v1026_v2 = vadd.f32 %v959_v61, %v161_v53  ;;  %v833_v3 = vpop.f32.mrb[63].mxu0  ;;  %v961_v4 = vpop.f32.mrb[63].mxu1 }
 0x1a2   :  { %v1226_v0 = vadd.f32 %v1593_v62, %v1155_v59  ;;  %v1124_v5 = vld [vmem:[#allocation2 + $0xe8] sm:$0xff] }
 0x1a3   :  { %v1156_v6 = vld [vmem:[#allocation2 + $0x1e8] sm:$0xff]  ;;  %v1258_v7 = vmax.f32 %v1194_v63, 0.0  ;;  %v1195_v9 = vadd.f32 %v1593_v62, %v1124_v5  ;;  %1059 = vst.msk [vmem:[#allocation2 + $0xf8] sm:$0xff] %vm33_vm0, %v994_v1  ;;  %1091 = vst.msk [vmem:[#allocation2 + $0x1f8] sm:$0xff] %vm33_vm0, %v1026_v2 }
 0x1a4   :  { %v1290_v8 = vmax.f32 %v1226_v0, 0.0  ;;  %v1227_v10 = vadd.f32 %v1593_v62, %v1156_v6 }
 0x1a5   :  { %1322 = vst.msk [vmem:[%s2254_s3 + $0xe0] sm:$0xff] %vm33_vm0, %v1258_v7  ;;  %v1259_v11 = vmax.f32 %v1195_v9, 0.0 }
 0x1a6   :  { %1354 = vst.msk [vmem:[%s2254_s3 + $0x1e0] sm:$0xff] %vm33_vm0, %v1290_v8  ;;  %v1291_v12 = vmax.f32 %v1227_v10, 0.0 }
 0x1a7   :  { %1323 = vst.msk [vmem:[%s2254_s3 + $0xe8] sm:$0xff] %vm33_vm0, %v1259_v11 }
 0x1a8   :  { %1355 = vst.msk [vmem:[%s2254_s3 + $0x1e8] sm:$0xff] %vm33_vm0, %v1291_v12  ;;  %v1125_v13 = vld [vmem:[#allocation2 + $0xf0] sm:$0xff] }
 0x1a9   :  { %v1157_v14 = vld [vmem:[#allocation2 + $0x1f0] sm:$0xff]  ;;  %v1196_v15 = vadd.f32 %v1593_v62, %v1125_v13 }
 0x1aa   :  { %v1228_v16 = vadd.f32 %v1593_v62, %v1157_v14  ;;  %v1126_v17 = vld [vmem:[#allocation2 + $0xf8] sm:$0xff] }
 0x1ab   :  { %v1158_v18 = vld [vmem:[#allocation2 + $0x1f8] sm:$0xff]  ;;  %v1260_v19 = vmax.f32 %v1196_v15, 0.0  ;;  %v1197_v21 = vadd.f32 %v1593_v62, %v1126_v17 }
 0x1ac   :  { %v1292_v20 = vmax.f32 %v1228_v16, 0.0  ;;  %v1229_v22 = vadd.f32 %v1593_v62, %v1158_v18 }
 0x1ad   :  { %1324 = vst.msk [vmem:[%s2254_s3 + $0xf0] sm:$0xff] %vm33_vm0, %v1260_v19  ;;  %v1261_v23 = vmax.f32 %v1197_v21, 0.0 }
 0x1ae   :  { %1356 = vst.msk [vmem:[%s2254_s3 + $0x1f0] sm:$0xff] %vm33_vm0, %v1292_v20  ;;  %v1293_v24 = vmax.f32 %v1229_v22, 0.0 }
 0x1af   :  { %1325 = vst.msk [vmem:[%s2254_s3 + $0xf8] sm:$0xff] %vm33_vm0, %v1261_v23 }
 0x1b0   :  { %1357 = vst.msk [vmem:[%s2254_s3 + $0x1f8] sm:$0xff] %vm33_vm0, %v1293_v24 }
 0x1b1   :  { %1362 = vsyncpa [#allocation4], 1 }

</bundles_post_ra>
